<compile_context>
chip_gen: v7x
topology: tpu7x:2x2x1
jax: 0.10.0
libtpu: 0.0.40
codegen_flags: <defaults>
</compile_context>

<pallas_src>
import math

import jax
import jax.numpy as jnp
from jax.experimental import pallas as pl
from jax.experimental.pallas import tpu as pltpu


# ----------------------------- helpers -----------------------------

def _round_up(x, m):
    return (x + m - 1) // m * m


def _choose_head_group(heads, head_size, n_pad,
                       target_lanes=256, max_out_block_bytes=8 << 20):
    """Largest divisor G of `heads` whose (G, N, N) f32 output block stays modest,
    stopping once the fused projection width 4*G*hs reaches the MXU lane target."""
    best = 1
    for g in range(1, heads + 1):
        if heads % g:
            continue
        if g * n_pad * n_pad * 4 > max_out_block_bytes:
            break
        best = g
        if 4 * g * head_size >= target_lanes:
            break
    return best


# ----------------------------- Pallas kernel -----------------------------

def _global_pointer_kernel(x_ref, w_ref, b_ref, rope_ref, mrow_ref, mcol_ref, o_ref):
    G = o_ref.shape[1]
    n = o_ref.shape[2]
    gh = w_ref.shape[-1] // 4          # G * head_size
    hs = gh // G
    inv_scale = 1.0 / float(hs) ** 0.5
    NEG = jnp.float32(-1e12 * inv_scale)   # sequence-mask fill (pre-scaled)
    BIG = jnp.float32(1e12 * inv_scale)    # strict-lower-tri penalty (pre-scaled)

    # One fused, lane-dense MXU projection produces q, k and their rotated copies:
    # RoPE permutation R and the 1/sqrt(hs) scale are already folded into the weights.
    x = x_ref[0]                                                        # (n, H)     bf16
    w = w_ref[0]                                                        # (H, 4*gh)  bf16
    proj = jnp.dot(x, w, preferred_element_type=jnp.float32) + b_ref[0]  # (n, 4*gh) f32

    # RoPE in f32: rope table = [cos | cos | sin | sin], proj = [q | k | q_rot | k_rot]
    tmp = proj * rope_ref[...]
    qk = (tmp[:, :2 * gh] + tmp[:, 2 * gh:]).astype(jnp.bfloat16)       # (n, 2*gh) = [q_rope | k_rope]

    # Masking terms shared by all heads in the group (computed once per grid step).
    valid = (mrow_ref[0] * mcol_ref[0]) > 0.0                           # (n, n) bool
    rid = jax.lax.broadcasted_iota(jnp.int32, (n, n), 0)
    cid = jax.lax.broadcasted_iota(jnp.int32, (n, n), 1)
    penalty = jnp.where(rid > cid, BIG, jnp.float32(0.0))               # strict lower triangle

    # Per-head (n, n) logits on the MXU; G is small, fully unrolled.
    for gi in range(G):
        qr = qk[:, gi * hs:(gi + 1) * hs]
        kr = qk[:, gh + gi * hs:gh + (gi + 1) * hs]
        logits = jax.lax.dot_general(qr, kr, (((1,), (1,)), ((), ())),
                                     preferred_element_type=jnp.float32)
        o_ref[0, gi] = (jnp.where(valid, logits, NEG) - penalty).astype(o_ref.dtype)


# ----------------------------- wrapper / glue -----------------------------

def global_pointer_forward(x, W, b, mask, heads, head_size):
    """x: (B, N, H) f32; W: (H, heads*2*hs); b: (heads*2*hs,); mask: (B, N) -> (B, heads, N, N)."""
    B, N, H = x.shape
    hs = head_size
    assert W.shape == (H, heads * 2 * hs)

    # Pad the sequence so the (N, N) logits tile is lane-dense (last dim % 128 == 0).
    n_pad = max(_round_up(N, 128), 128)

    # Head grouping: G heads per grid step.
    G = _choose_head_group(heads, hs, n_pad)
    ng = heads // G
    gh = G * hs

    # Split the linear weight/bias per head (torch.split order), fold the RoPE rotation R
    # and the 1/sqrt(hs) scale into the q-side weights.
    s = 1.0 / math.sqrt(hs)
    W4 = W.reshape(H, heads, 2, hs)
    Wq = jnp.transpose(W4[:, :, 0, :], (1, 0, 2))      # (heads, H, hs)
    Wk = jnp.transpose(W4[:, :, 1, :], (1, 0, 2))      # (heads, H, hs)
    b2 = b.reshape(heads, 2, hs)
    bq, bk = b2[:, 0, :], b2[:, 1, :]                  # (heads, hs)

    # Signed permutation: (v @ R)[2i] = -v[2i+1], (v @ R)[2i+1] = v[2i]
    even = jnp.arange(0, hs, 2)
    odd = even + 1
    R = jnp.zeros((hs, hs), jnp.float32).at[odd, even].set(-1.0).at[even, odd].set(1.0)

    WqR = jnp.einsum('ahd,de->ahe', Wq, R)
    WkR = jnp.einsum('ahd,de->ahe', Wk, R)
    bqR = bq @ R
    bkR = bk @ R

    def grp_w(M):   # (heads, H, hs) -> (ng, H, G*hs), head-major columns within a group
        return M.reshape(ng, G, H, hs).transpose(0, 2, 1, 3).reshape(ng, H, gh)

    def grp_b(v):   # (heads, hs) -> (ng, 1, G*hs)
        return v.reshape(ng, gh)[:, None, :]

    # Fused slab columns: [ q | k | q_rot | k_rot ], q-side pre-scaled by 1/sqrt(hs).
    W_all = jnp.concatenate([grp_w(Wq * s), grp_w(Wk), grp_w(WqR * s), grp_w(WkR)],
                            axis=-1).astype(jnp.bfloat16)                 # (ng, H, 4*gh)
    b_all = jnp.concatenate([grp_b(bq * s), grp_b(bk), grp_b(bqR * s), grp_b(bkR)],
                            axis=-1).astype(jnp.float32)                  # (ng, 1, 4*gh)

    # RoPE tables, faithful to SinusoidalPositionEmbedding + the .repeat(1,1,1,2) tiling:
    # multiplier for column (head, d) is cos/sin(n * 10000^{-2*(d mod hs/2)/hs}).
    idx = jnp.arange(hs // 2, dtype=jnp.float32)
    inv_freq = jnp.power(10000.0, -2.0 * idx / hs)                        # (hs/2,)
    theta = jnp.arange(n_pad, dtype=jnp.float32)[:, None] * inv_freq      # (n_pad, hs/2)
    cos_g = jnp.tile(jnp.cos(theta), (1, 2 * G))                          # (n_pad, G*hs)
    sin_g = jnp.tile(jnp.sin(theta), (1, 2 * G))
    rope_tab = jnp.concatenate([cos_g, cos_g, sin_g, sin_g], axis=-1)     # (n_pad, 4*gh) f32

    # Pad activations / masks; cast x to bf16 for the MXU.
    x_p = jnp.pad(x, ((0, 0), (0, n_pad - N), (0, 0))).astype(jnp.bfloat16)
    mask_p = jnp.pad(mask.astype(jnp.float32), ((0, 0), (0, n_pad - N)))
    mask_row = mask_p.reshape(B, n_pad, 1)
    mask_col = mask_p.reshape(B, 1, n_pad)

    out_shape = jax.ShapeDtypeStruct((B, heads, n_pad, n_pad), jnp.float32)

    # Grid: (batch, head_group). x is revisited (stays VMEM-resident) across the inner
    # head-group axis; both axes are independent -> "parallel" (lets v7x use both TCs).
    grid = (B, ng)
    in_specs = [
        pl.BlockSpec((1, n_pad, H), lambda bb, gg: (bb, 0, 0)),          # x (bf16)
        pl.BlockSpec((1, H, 4 * gh), lambda bb, gg: (gg, 0, 0)),         # fused weights (bf16)
        pl.BlockSpec((1, 1, 4 * gh), lambda bb, gg: (gg, 0, 0)),         # fused bias (f32)
        pl.BlockSpec((n_pad, 4 * gh), lambda bb, gg: (0, 0)),            # rope table (f32)
        pl.BlockSpec((1, n_pad, 1), lambda bb, gg: (bb, 0, 0)),          # row mask
        pl.BlockSpec((1, 1, n_pad), lambda bb, gg: (bb, 0, 0)),          # col mask
    ]
    # TODO(synk): for large N, add (TM, TN) grid tiling of the logits (separate q-row /
    # k-col x blocks) so the resident output block fits v7x's 64 MiB VMEM; here a single
    # head-group block of (G, n_pad, n_pad) f32 is assumed to fit.
    out_specs = pl.BlockSpec((1, G, n_pad, n_pad), lambda bb, gg: (bb, gg, 0, 0))

    out = pl.pallas_call(
        _global_pointer_kernel,
        out_shape=out_shape,
        grid=grid,
        in_specs=in_specs,
        out_specs=out_specs,
        compiler_params=pltpu.CompilerParams(
            dimension_semantics=("parallel", "parallel")),
    )(x_p, W_all, b_all, rope_tab, mask_row, mask_col)

    return out[:, :, :N, :N]


# ----------------------------- pure-JAX reference -----------------------------

def global_pointer_reference(x, W, b, mask, heads, hs):
    B, N, H = x.shape
    proj = jnp.einsum('bnh,ho->bno', x, W,
                      precision=jax.lax.Precision.HIGHEST) + b
    proj = proj.reshape(B, N, heads, 2 * hs)
    qw, kw = proj[..., :hs], proj[..., hs:]

    idx = jnp.arange(hs // 2, dtype=jnp.float32)
    inv_freq = jnp.power(10000.0, -2.0 * idx / hs)
    emb = jnp.arange(N, dtype=jnp.float32)[:, None] * inv_freq             # (N, hs/2)
    pos = jnp.stack([jnp.sin(emb), jnp.cos(emb)], axis=-1).reshape(N, hs)  # (N, hs)
    cos_pos = jnp.tile(pos[None, :, None, 1::2], (1, 1, 1, 2))
    sin_pos = jnp.tile(pos[None, :, None, 0::2], (1, 1, 1, 2))

    qw2 = jnp.stack([-qw[..., 1::2], qw[..., ::2]], axis=4).reshape(qw.shape)
    kw2 = jnp.stack([-kw[..., 1::2], kw[..., ::2]], axis=4).reshape(kw.shape)
    qw = qw * cos_pos + qw2 * sin_pos
    kw = kw * cos_pos + kw2 * sin_pos

    logits = jnp.einsum('bmhd,bnhd->bhmn', qw, kw,
                        precision=jax.lax.Precision.HIGHEST)
    m = mask.astype(logits.dtype)
    logits = logits * m[:, None, :, None] + (-1e12) * (1.0 - m[:, None, :, None])
    logits = logits * m[:, None, None, :] + (-1e12) * (1.0 - m[:, None, None, :])
    tril = jnp.tril(jnp.ones_like(logits), k=-1)
    logits = logits - tril * 1e12
    return logits / hs ** 0.5


# ----------------------------- main -----------------------------

if __name__ == "__main__":
    B, N, H = 2, 8, 32
    heads, head_size = 4, 16

    key = jax.random.PRNGKey(0)
    kx, kw, kb = jax.random.split(key, 3)

    x = jax.random.normal(kx, (B, N, H), dtype=jnp.float32)
    # nn.Linear(hidden, heads*head_size*2)-style deterministic init
    bound = 1.0 / math.sqrt(H)
    W = jax.random.uniform(kw, (H, heads * head_size * 2),
                           minval=-bound, maxval=bound, dtype=jnp.float32)
    b = jax.random.uniform(kb, (heads * head_size * 2,),
                           minval=-bound, maxval=bound, dtype=jnp.float32)
    # sequence mask: batch 0 full length, batch 1 length 6
    mask = jnp.array([[1, 1, 1, 1, 1, 1, 1, 1],
                      [1, 1, 1, 1, 1, 1, 0, 0]], dtype=jnp.float32)

    out = global_pointer_forward(x, W, b, mask, heads, head_size)
    out = jax.block_until_ready(out)

    ref = global_pointer_reference(x, W, b, mask, heads, head_size)
    ref = jax.block_until_ready(ref)

    assert out.shape == (B, heads, N, N)
    max_diff = float(jnp.max(jnp.abs(out - ref)))
    # bf16 MXU operands with f32 accumulation: expected abs error ~1e-3..1e-2 on O(1)
    # logits; rtol covers the ~1e11-magnitude masked entries (which match exactly).
    assert jnp.allclose(out, ref, rtol=1e-2, atol=5e-2), (
        "max abs diff %e" % max_diff)

    print("KERNEL_OK")
</pallas_src>

<mosaic_0001>
module attributes {stable_mosaic.version = 11 : i64} {
  func.func @_global_pointer_kernel(%arg0: i32, %arg1: i32, %arg2: memref<1x128x32xbf16, #tpu.memory_space<vmem>>, %arg3: memref<1x32x256xbf16, #tpu.memory_space<vmem>>, %arg4: memref<1x1x256xf32, #tpu.memory_space<vmem>>, %arg5: memref<128x256xf32, #tpu.memory_space<vmem>>, %arg6: memref<1x128x1xf32, #tpu.memory_space<vmem>>, %arg7: memref<1x1x128xf32, #tpu.memory_space<vmem>>, %arg8: memref<1x4x128x128xf32, #tpu.memory_space<vmem>>) attributes {dimension_semantics = [#tpu.dimension_semantics<parallel>, #tpu.dimension_semantics<parallel>], iteration_bounds = array<i64: 2, 1>, scalar_prefetch = 0 : i64, scratch_operands = 0 : i64, tpu.core_type = #tpu.core_type<tc>, window_params = [{transform_indices = @transform_0, window_bounds = array<i64: 1, 128, 32>}, {transform_indices = @transform_1, window_bounds = array<i64: 1, 32, 256>}, {transform_indices = @transform_2, window_bounds = array<i64: 1, 1, 256>}, {pipeline_mode = #tpu.pipeline_mode<synchronous>, transform_indices = @transform_3, window_bounds = array<i64: 128, 256>}, {transform_indices = @transform_4, window_bounds = array<i64: 1, 128, 1>}, {transform_indices = @transform_5, window_bounds = array<i64: 1, 1, 128>}, {transform_indices = @transform_6, window_bounds = array<i64: 1, 4, 128, 128>}]} {
    %c0 = arith.constant 0 : index
    %c0_0 = arith.constant 0 : index
    %c0_1 = arith.constant 0 : index
    %0 = vector.load %arg2[%c0, %c0_0, %c0_1] : memref<1x128x32xbf16, #tpu.memory_space<vmem>>, vector<1x128x32xbf16>
    %1 = vector.shape_cast %0 : vector<1x128x32xbf16> to vector<128x32xbf16>
    %c0_2 = arith.constant 0 : index
    %c0_3 = arith.constant 0 : index
    %c0_4 = arith.constant 0 : index
    %2 = vector.load %arg3[%c0_2, %c0_3, %c0_4] : memref<1x32x256xbf16, #tpu.memory_space<vmem>>, vector<1x32x256xbf16>
    %3 = vector.shape_cast %2 : vector<1x32x256xbf16> to vector<32x256xbf16>
    %cst = arith.constant dense<0.000000e+00> : vector<128x256xf32>
    %4 = tpu.matmul %1, %3, %cst {dimension_numbers = #tpu.dot_dimension_numbers<[1], [0], [0], [1], [0, 0, 1, 1], [], []>} : vector<128x32xbf16>, vector<32x256xbf16>, vector<128x256xf32> -> vector<128x256xf32>
    %c0_5 = arith.constant 0 : index
    %c0_6 = arith.constant 0 : index
    %c0_7 = arith.constant 0 : index
    %5 = vector.load %arg4[%c0_5, %c0_6, %c0_7] : memref<1x1x256xf32, #tpu.memory_space<vmem>>, vector<1x1x256xf32>
    %6 = vector.shape_cast %5 : vector<1x1x256xf32> to vector<1x256xf32>
    %7 = vector.broadcast %6 : vector<1x256xf32> to vector<128x256xf32>
    %8 = arith.addf %4, %7 : vector<128x256xf32>
    %c0_8 = arith.constant 0 : index
    %c0_9 = arith.constant 0 : index
    %9 = vector.load %arg5[%c0_8, %c0_9] : memref<128x256xf32, #tpu.memory_space<vmem>>, vector<128x256xf32>
    %10 = arith.mulf %8, %9 : vector<128x256xf32>
    %11 = vector.extract_strided_slice %10 {offsets = [0, 0], sizes = [128, 128], strides = [1, 1]} : vector<128x256xf32> to vector<128x128xf32>
    %12 = vector.extract_strided_slice %10 {offsets = [0, 128], sizes = [128, 128], strides = [1, 1]} : vector<128x256xf32> to vector<128x128xf32>
    %13 = arith.addf %11, %12 : vector<128x128xf32>
    %14 = arith.truncf %13 : vector<128x128xf32> to vector<128x128xbf16>
    %c0_10 = arith.constant 0 : index
    %c0_11 = arith.constant 0 : index
    %c0_12 = arith.constant 0 : index
    %15 = vector.load %arg6[%c0_10, %c0_11, %c0_12] : memref<1x128x1xf32, #tpu.memory_space<vmem>>, vector<1x128x1xf32>
    %16 = vector.shape_cast %15 : vector<1x128x1xf32> to vector<128x1xf32>
    %c0_13 = arith.constant 0 : index
    %c0_14 = arith.constant 0 : index
    %c0_15 = arith.constant 0 : index
    %17 = vector.load %arg7[%c0_13, %c0_14, %c0_15] : memref<1x1x128xf32, #tpu.memory_space<vmem>>, vector<1x1x128xf32>
    %18 = vector.shape_cast %17 : vector<1x1x128xf32> to vector<1x128xf32>
    %19 = vector.broadcast %16 : vector<128x1xf32> to vector<128x128xf32>
    %20 = vector.broadcast %18 : vector<1x128xf32> to vector<128x128xf32>
    %21 = arith.mulf %19, %20 : vector<128x128xf32>
    %cst_16 = arith.constant 0.000000e+00 : f32
    %22 = vector.broadcast %cst_16 : f32 to vector<128x128xf32>
    %23 = arith.cmpf ogt, %21, %22 : vector<128x128xf32>
    %24 = tpu.iota {dimensions = array<i32: 0>} : vector<128x128xi32>
    %25 = tpu.iota {dimensions = array<i32: 1>} : vector<128x128xi32>
    %26 = arith.cmpi sgt, %24, %25 : vector<128x128xi32>
    %cst_17 = arith.constant 2.500000e+11 : f32
    %cst_18 = arith.constant 0.000000e+00 : f32
    %27 = vector.broadcast %cst_17 : f32 to vector<128x128xf32>
    %28 = vector.broadcast %cst_18 : f32 to vector<128x128xf32>
    %29 = arith.select %26, %27, %28 : vector<128x128xi1>, vector<128x128xf32>
    %30 = vector.extract_strided_slice %14 {offsets = [0, 0], sizes = [128, 16], strides = [1, 1]} : vector<128x128xbf16> to vector<128x16xbf16>
    %31 = vector.extract_strided_slice %14 {offsets = [0, 64], sizes = [128, 16], strides = [1, 1]} : vector<128x128xbf16> to vector<128x16xbf16>
    %cst_19 = arith.constant dense<0.000000e+00> : vector<128x128xf32>
    %32 = tpu.matmul %30, %31, %cst_19 {dimension_numbers = #tpu.dot_dimension_numbers<[1], [1], [0], [0], [0, 0, 1, 0], [], []>} : vector<128x16xbf16>, vector<128x16xbf16>, vector<128x128xf32> -> vector<128x128xf32>
    %cst_20 = arith.constant -2.500000e+11 : f32
    %33 = vector.broadcast %cst_20 : f32 to vector<128x128xf32>
    %34 = arith.select %23, %32, %33 : vector<128x128xi1>, vector<128x128xf32>
    %35 = arith.subf %34, %29 : vector<128x128xf32>
    %c0_21 = arith.constant 0 : index
    %c0_22 = arith.constant 0 : index
    %c0_23 = arith.constant 0 : index
    %c0_24 = arith.constant 0 : index
    %36 = vector.load %arg8[%c0_21, %c0_22, %c0_23, %c0_24] : memref<1x4x128x128xf32, #tpu.memory_space<vmem>>, vector<1x1x128x128xf32>
    %37 = vector.shape_cast %36 : vector<1x1x128x128xf32> to vector<128x128xf32>
    %38 = vector.shape_cast %35 : vector<128x128xf32> to vector<1x1x128x128xf32>
    tpu.vector_store %arg8[%c0_21, %c0_22, %c0_23, %c0_24], %38 {strides = array<i32>} : memref<1x4x128x128xf32, #tpu.memory_space<vmem>>, vector<1x1x128x128xf32>,
    %39 = vector.extract_strided_slice %14 {offsets = [0, 16], sizes = [128, 16], strides = [1, 1]} : vector<128x128xbf16> to vector<128x16xbf16>
    %40 = vector.extract_strided_slice %14 {offsets = [0, 80], sizes = [128, 16], strides = [1, 1]} : vector<128x128xbf16> to vector<128x16xbf16>
    %cst_25 = arith.constant dense<0.000000e+00> : vector<128x128xf32>
    %41 = tpu.matmul %39, %40, %cst_25 {dimension_numbers = #tpu.dot_dimension_numbers<[1], [1], [0], [0], [0, 0, 1, 0], [], []>} : vector<128x16xbf16>, vector<128x16xbf16>, vector<128x128xf32> -> vector<128x128xf32>
    %cst_26 = arith.constant -2.500000e+11 : f32
    %42 = vector.broadcast %cst_26 : f32 to vector<128x128xf32>
    %43 = arith.select %23, %41, %42 : vector<128x128xi1>, vector<128x128xf32>
    %44 = arith.subf %43, %29 : vector<128x128xf32>
    %c0_27 = arith.constant 0 : index
    %c1 = arith.constant 1 : index
    %c0_28 = arith.constant 0 : index
    %c0_29 = arith.constant 0 : index
    %45 = vector.load %arg8[%c0_27, %c1, %c0_28, %c0_29] : memref<1x4x128x128xf32, #tpu.memory_space<vmem>>, vector<1x1x128x128xf32>
    %46 = vector.shape_cast %45 : vector<1x1x128x128xf32> to vector<128x128xf32>
    %47 = vector.shape_cast %44 : vector<128x128xf32> to vector<1x1x128x128xf32>
    tpu.vector_store %arg8[%c0_27, %c1, %c0_28, %c0_29], %47 {strides = array<i32>} : memref<1x4x128x128xf32, #tpu.memory_space<vmem>>, vector<1x1x128x128xf32>,
    %48 = vector.extract_strided_slice %14 {offsets = [0, 32], sizes = [128, 16], strides = [1, 1]} : vector<128x128xbf16> to vector<128x16xbf16>
    %49 = vector.extract_strided_slice %14 {offsets = [0, 96], sizes = [128, 16], strides = [1, 1]} : vector<128x128xbf16> to vector<128x16xbf16>
    %cst_30 = arith.constant dense<0.000000e+00> : vector<128x128xf32>
    %50 = tpu.matmul %48, %49, %cst_30 {dimension_numbers = #tpu.dot_dimension_numbers<[1], [1], [0], [0], [0, 0, 1, 0], [], []>} : vector<128x16xbf16>, vector<128x16xbf16>, vector<128x128xf32> -> vector<128x128xf32>
    %cst_31 = arith.constant -2.500000e+11 : f32
    %51 = vector.broadcast %cst_31 : f32 to vector<128x128xf32>
    %52 = arith.select %23, %50, %51 : vector<128x128xi1>, vector<128x128xf32>
    %53 = arith.subf %52, %29 : vector<128x128xf32>
    %c0_32 = arith.constant 0 : index
    %c2 = arith.constant 2 : index
    %c0_33 = arith.constant 0 : index
    %c0_34 = arith.constant 0 : index
    %54 = vector.load %arg8[%c0_32, %c2, %c0_33, %c0_34] : memref<1x4x128x128xf32, #tpu.memory_space<vmem>>, vector<1x1x128x128xf32>
    %55 = vector.shape_cast %54 : vector<1x1x128x128xf32> to vector<128x128xf32>
    %56 = vector.shape_cast %53 : vector<128x128xf32> to vector<1x1x128x128xf32>
    tpu.vector_store %arg8[%c0_32, %c2, %c0_33, %c0_34], %56 {strides = array<i32>} : memref<1x4x128x128xf32, #tpu.memory_space<vmem>>, vector<1x1x128x128xf32>,
    %57 = vector.extract_strided_slice %14 {offsets = [0, 48], sizes = [128, 16], strides = [1, 1]} : vector<128x128xbf16> to vector<128x16xbf16>
    %58 = vector.extract_strided_slice %14 {offsets = [0, 112], sizes = [128, 16], strides = [1, 1]} : vector<128x128xbf16> to vector<128x16xbf16>
    %cst_35 = arith.constant dense<0.000000e+00> : vector<128x128xf32>
    %59 = tpu.matmul %57, %58, %cst_35 {dimension_numbers = #tpu.dot_dimension_numbers<[1], [1], [0], [0], [0, 0, 1, 0], [], []>} : vector<128x16xbf16>, vector<128x16xbf16>, vector<128x128xf32> -> vector<128x128xf32>
    %cst_36 = arith.constant -2.500000e+11 : f32
    %60 = vector.broadcast %cst_36 : f32 to vector<128x128xf32>
    %61 = arith.select %23, %59, %60 : vector<128x128xi1>, vector<128x128xf32>
    %62 = arith.subf %61, %29 : vector<128x128xf32>
    %c0_37 = arith.constant 0 : index
    %c3 = arith.constant 3 : index
    %c0_38 = arith.constant 0 : index
    %c0_39 = arith.constant 0 : index
    %63 = vector.load %arg8[%c0_37, %c3, %c0_38, %c0_39] : memref<1x4x128x128xf32, #tpu.memory_space<vmem>>, vector<1x1x128x128xf32>
    %64 = vector.shape_cast %63 : vector<1x1x128x128xf32> to vector<128x128xf32>
    %65 = vector.shape_cast %62 : vector<128x128xf32> to vector<1x1x128x128xf32>
    tpu.vector_store %arg8[%c0_37, %c3, %c0_38, %c0_39], %65 {strides = array<i32>} : memref<1x4x128x128xf32, #tpu.memory_space<vmem>>, vector<1x1x128x128xf32>,
    return
  }
  func.func @transform_0(%arg0: i32, %arg1: i32) -> (i32, i32, i32) {
    %c0_i32 = arith.constant 0 : i32
    %c0_i32_0 = arith.constant 0 : i32
    %c0_i32_1 = arith.constant 0 : i32
    return %arg0, %c0_i32, %c0_i32_0 : i32, i32, i32
  }
  func.func @transform_1(%arg0: i32, %arg1: i32) -> (i32, i32, i32) {
    %c0_i32 = arith.constant 0 : i32
    %c0_i32_0 = arith.constant 0 : i32
    %c0_i32_1 = arith.constant 0 : i32
    return %arg1, %c0_i32, %c0_i32_0 : i32, i32, i32
  }
  func.func @transform_2(%arg0: i32, %arg1: i32) -> (i32, i32, i32) {
    %c0_i32 = arith.constant 0 : i32
    %c0_i32_0 = arith.constant 0 : i32
    %c0_i32_1 = arith.constant 0 : i32
    return %arg1, %c0_i32, %c0_i32_0 : i32, i32, i32
  }
  func.func @transform_3(%arg0: i32, %arg1: i32) -> (i32, i32) {
    %c0_i32 = arith.constant 0 : i32
    %c0_i32_0 = arith.constant 0 : i32
    %c0_i32_1 = arith.constant 0 : i32
    return %c0_i32, %c0_i32_0 : i32, i32
  }
  func.func @transform_4(%arg0: i32, %arg1: i32) -> (i32, i32, i32) {
    %c0_i32 = arith.constant 0 : i32
    %c0_i32_0 = arith.constant 0 : i32
    %c0_i32_1 = arith.constant 0 : i32
    return %arg0, %c0_i32, %c0_i32_0 : i32, i32, i32
  }
  func.func @transform_5(%arg0: i32, %arg1: i32) -> (i32, i32, i32) {
    %c0_i32 = arith.constant 0 : i32
    %c0_i32_0 = arith.constant 0 : i32
    %c0_i32_1 = arith.constant 0 : i32
    return %arg0, %c0_i32, %c0_i32_0 : i32, i32, i32
  }
  func.func @transform_6(%arg0: i32, %arg1: i32) -> (i32, i32, i32, i32) {
    %c0_i32 = arith.constant 0 : i32
    %c0_i32_0 = arith.constant 0 : i32
    %c0_i32_1 = arith.constant 0 : i32
    return %arg0, %arg1, %c0_i32, %c0_i32_0 : i32, i32, i32, i32
  }
}

</mosaic_0001>

<bundles_post_ra>
// kernel: tpu_custom_call.1
= control target key start
LH: loop header
LB: loop body
LE: loop exit
PB: predicated region body
PF: predicated region fallthrough
CT: control target
= control target key end

     0   :  { %11 = vsyncpa [#allocation3], 0  ;;  %s3381_s0 = inlined_call_operand.vmem [shape: bf16[2,128,32], index: 0, kind: input, shape index: {}]   ;;  %s3382_s1 = inlined_call_operand.vmem [shape: bf16[1,32,256], index: 1, kind: input, shape index: {}]   ;;  %s3383_s2 = inlined_call_operand.vmem [shape: f32[1,1,256], index: 2, kind: input, shape index: {}]   ;;  %s3384_s3 = inlined_call_operand.vmem [shape: f32[128,256], index: 3, kind: input, shape index: {}]   ;;  %s3385_s4 = inlined_call_operand.vmem [shape: f32[2,128,1], index: 4, kind: input, shape index: {}]   ;;  %s3386_s5 = inlined_call_operand.vmem [shape: f32[2,1,128], index: 5, kind: input, shape index: {}]   ;;  %s3387_s6 = inlined_call_operand.hbm [shape: f32[2,4,128,128], index: 6, kind: output, shape index: {}]  }
   0x1   :  { %13 = vsyncpa [#allocation3 + $0x1], 0  ;;  %s2432_s21 = smov 0   ;;  %s2434_s22 = smov 0  }
   0x2   :  { %s2436_s23 = smov 0   ;;  %s2438_s24 = smov 0  }
   0x3   :  { %s2440_s25 = smov 0   ;;  %s2442_s26 = smov 0  }
   0x4 LB: > { %s1878_s27 = sadd.s32 4294967295, %s2383_s26   ;;  %s1879_s28 = sadd.s32 4294967294, %s2383_s26   ;;  %s2383_s26 = sphi %s2442_s26, %s19_s26   ;;  %s2379_s25 = sphi %s2440_s25, %s3403_s25   ;;  %s2375_s24 = sphi %s2438_s24, %s3402_s24   ;;  %s2371_s23 = sphi %s2436_s23, %s3401_s23   ;;  %s2367_s22 = sphi %s2434_s22, %s3400_s22   ;;  %s2363_s21 = sphi %s2432_s21, %s3399_s21  }
   0x5   : > { %s31_s29 = sadd.s32 1, %s2379_s25  ;;  %s191_s30 = sadd.s32 1, %s2371_s23 }
   0x6   : > { %p33_p0 = scmp.ge.s32.totalorder %s31_s29, 2  ;;  %p201_p1 = scmp.ne.s32.totalorder %s2371_s23, %s2367_s22 }
   0x7   : > { %p202_p2 = scmp.eq.s32.totalorder %s1878_s27, 1  ;;  %p207_p3 = scmp.ne.s32.totalorder %s2367_s22, %s2363_s21 }
   0x8   : > { %s3405_s29 = smov (%p33_p0, %s31_s29), 0  ;;  %p208_p5 = scmp.eq.s32.totalorder %s1879_s28, 1 }
   0x9   : > { %p2472_p4 = por %p202_p2, %p201_p1  ;;  %s186_s8 = ssub.s32 %s2379_s25, %s3405_s29 }
   0xa   : > { %p1884_p6 = scmp.ge.s32.totalorder %s2383_s26, 1  ;;  %p189_p7 = scmp.eq.s32.totalorder %s186_s8, 0 }
   0xb   : > { %p2479_p8 = por %p208_p5, %p207_p3  ;;  %p266_p9 = scmp.lt.s32.totalorder %s2383_s26, 3 }
   0xc   : > { %s2485_s10 = scalar_select %p189_p7, %s2371_s23, %s191_s30  }
   0xd   : > { %p267_p10 = pnand %p1884_p6, %p266_p9 }
   0xe   : > { %v2291_v0 = vld [vmem:[%s3382_s1 + $0x4] ss:$8 sps:$4 sm:$0xff] (!%p267_p10)   ;;  %p313_p11 = scmp.lt.s32.totalorder (!%p267_p10), %s2375_s24, 1  ;;  %v2293_v1 = vld [vmem:[%s3382_s1] ss:$8 sps:$4 sm:$0xff] (!%p267_p10)   ;;  %v2385_v2 = vmov (!%p267_p10), 0   ;;  %v359_v13 = vlaneseq (!%p267_p10) }
   0xf   : > { %270 = sbr.rel (%p267_p10) target bundleno = 755 (0x2f3), region = 44  ;;  %486 = vmatprep.mubr.bf16.mxu0 (!%p267_p10), %v2385_v2  ;;  %2290 = vset.pattern.permute.xlu1 (!%p267_p10), %v2385_v2  ;;  %v2294_v3 = vld [vmem:[%s3382_s1 + $0x14] ss:$8 sps:$4 sm:$0xff] (!%p267_p10)   ;;  %v2296_v4 = vld [vmem:[%s3382_s1 + $0x10] ss:$8 sps:$4 sm:$0xff] (!%p267_p10)   ;;  %vm429_vm0 = vcmask (!%p267_p10), 261120  }
  0x10   : > { %454 = vmatprep.subr.bf16.mxu0 (!%p267_p10), %v2291_v0  ;;  %2289 = vset.pattern.permute.xlu0 (!%p267_p10), %v2385_v2  ;;  %v2516_v14 = vshrl.u32 (!%p267_p10), %v359_v13, 7  ;;  %v357_v16 = vld [vmem:[%s3383_s2] sm:$0x3] (!%p267_p10)  ;;  %v568_v24 = vld [vmem:[%s3384_s3 + $0x8] sm:$0xff] (!%p267_p10)  ;;  %v569_v27 = vld [vmem:[%s3384_s3 + $0x10] sm:$0xff] (!%p267_p10)  ;;  %vm865_vm1 = vcmask (!%p267_p10), 130048  }
  0x11   : > { %455 = vmatpush1.bf16.msra.mxu0 (!%p267_p10), %v2293_v1  ;;  %v567_v21 = vld [vmem:[%s3384_s3] sm:$0xff] (!%p267_p10)  ;;  %v570_v31 = vld [vmem:[%s3384_s3 + $0x18] sm:$0xff] (!%p267_p10)  ;;  %v572_v42 = vld [vmem:[%s3384_s3 + $0x28] sm:$0xff] (!%p267_p10)  ;;  %s2386_s15 = smov (!%p267_p10), 64   ;;  %s2387_s19 = smov (!%p267_p10), 48  }
  0x12   : > { %456 = vmatprep.subr.bf16.mxu0 (!%p267_p10), %v2294_v3  ;;  %v361_v15 = vsub.s32 (!%p267_p10), 0, %v2516_v14  ;;  %v365_v17 = vsub.s32 (!%p267_p10), 1, %v2516_v14  ;;  %v571_v39 = vld [vmem:[%s3384_s3 + $0x20] sm:$0xff] (!%p267_p10)  ;;  %v573_v46 = vld [vmem:[%s3384_s3 + $0x30] sm:$0xff] (!%p267_p10)  ;;  %v574_v50 = vld [vmem:[%s3384_s3 + $0x38] sm:$0xff] (!%p267_p10)  ;;  %s2388_s28 = smov (!%p267_p10), 32  }
  0x13   : > { %v575_v58 = vld [vmem:[%s3384_s3 + $0x40] sm:$0xff] (!%p267_p10)  ;;  %v576_v61 = vld [vmem:[%s3384_s3 + $0x48] sm:$0xff] (!%p267_p10)  ;;  %v577_v1 = vld [vmem:[%s3384_s3 + $0x50] sm:$0xff] (!%p267_p10)  ;;  %s2390_s8 = smov (!%p267_p10), 16   ;;  %s310_s27 = sand.u32 (!%p267_p10), 1, %s2367_s22  }
  0x14   : > { %v2523_v18 = vrot.slane (!%p267_p10), %v357_v16, %v361_v15  ;;  %v2525_v19 = vrot.slane (!%p267_p10), %v357_v16, %v365_v17  ;;  %v579_v15 = vld [vmem:[%s3384_s3 + $0x60] sm:$0xff] (!%p267_p10)  ;;  %s2394_s13 = smov (!%p267_p10), [#allocation2]  }
  0x15   : > { %457 = vmatpush1.bf16.msra.mxu0 (!%p267_p10), %v2296_v4 }
  0x16   : > { %s2498_s17 = scalar_select %p313_p11, %s2375_s24, 1 }
  0x18   : > { %s1996_s20 = sshll.u32 %s2498_s17, 6  ;;  %s1997_s11 = sshll.u32 %s2498_s17, 7 }
  0x19   : > { %s317_s30 = scalar_lea.vmem %s3381_s0, %s1996_s20  ;;  %s2772_s14 = scalar_lea.vmem %s3385_s4, %s1997_s11 }
  0x1a   : > { %v2297_v5 = vld [vmem:[%s317_s30] sm:$0xff]   ;;  %v2298_v6 = vld [vmem:[%s317_s30 + $0x8] sm:$0xff]   ;;  %v2299_v7 = vld [vmem:[%s317_s30 + $0x10] sm:$0xff]   ;;  %s334_s20 = scalar_lea.vmem %s3386_s5, %s2498_s17  ;;  %s2910_s17 = sshll.u32 %s310_s27, 9 }
  0x1b   : > { %1902 = vmatmul.mubr.msk.bf16.vlgmr.msra.gmra.mrb[0].mxu0 %vm429_vm0, %v2297_v5  ;;  %v2300_v8 = vld [vmem:[%s317_s30 + $0x18] sm:$0xff]   ;;  %v2301_v9 = vld [vmem:[%s317_s30 + $0x20] sm:$0xff]   ;;  %v2302_v10 = vld [vmem:[%s317_s30 + $0x28] sm:$0xff]   ;;  %s3335_s11 = scalar_lea.sflag [#allocation3], %s310_s27 }
  0x1c   : > { %496 = vmatprep.mubr.bf16.mxu0 %v2385_v2  ;;  %v2303_v11 = vld [vmem:[%s317_s30 + $0x30] sm:$0xff]   ;;  %v2304_v12 = vld [vmem:[%s317_s30 + $0x38] sm:$0xff]   ;;  %s2389_s30 = smov 112  }
  0x1d   : > { %v578_v5 = vld [vmem:[%s3384_s3 + $0x58] sm:$0xff] }
  0x23   : > { %1903 = vmatmul.mubr.msk.bf16.gmra.mrb[4].mxu0 %vm429_vm0, %v2298_v6 }
  0x24   : > { %506 = vmatprep.mubr.bf16.mxu0 %v2385_v2 }
  0x2b   : > { %1904 = vmatmul.mubr.msk.bf16.gmra.mrb[8].mxu0 %vm429_vm0, %v2299_v7 }
  0x2c   : > { %516 = vmatprep.mubr.bf16.mxu0 %v2385_v2 }
  0x33   : > { %1905 = vmatmul.mubr.msk.bf16.gmra.mrb[12].mxu0 %vm429_vm0, %v2300_v8 }
  0x34   : > { %526 = vmatprep.mubr.bf16.mxu0 %v2385_v2 }
  0x3b   : > { %1906 = vmatmul.mubr.msk.bf16.gmra.mrb[16].mxu0 %vm429_vm0, %v2301_v9 }
  0x3c   : > { %536 = vmatprep.mubr.bf16.mxu0 %v2385_v2 }
  0x43   : > { %1907 = vmatmul.mubr.msk.bf16.gmra.mrb[20].mxu0 %vm429_vm0, %v2302_v10 }
  0x44   : > { %546 = vmatprep.mubr.bf16.mxu0 %v2385_v2 }
  0x4b   : > { %1908 = vmatmul.mubr.msk.bf16.gmra.mrb[24].mxu0 %vm429_vm0, %v2303_v11 }
  0x4c   : > { %556 = vmatprep.mubr.bf16.mxu0 %v2385_v2 }
  0x53   : > { %1909 = vmatmul.mubr.msk.bf16.gmra.mrb[28].mxu0 %vm429_vm0, %v2304_v12 }
  0xee   : > { %v488_v20 = vpop.f32.mrb[0].mxu0 }
  0xef   : > { %v489_v22 = vadd.f32 %v488_v20, %v2523_v18  ;;  %v490_v23 = vpop.f32.mrb[1].mxu0  ;;  %v580_v20 = vld [vmem:[%s3384_s3 + $0x68] sm:$0xff] }
  0xf0   : > { %v491_v25 = vadd.f32 %v490_v23, %v2525_v19  ;;  %v492_v26 = vpop.f32.mrb[2].mxu0 }
  0xf1   : > { %v599_v28 = vmul.f32 %v567_v21, %v489_v22  ;;  %v493_v29 = vadd.f32 %v492_v26, %v2523_v18  ;;  %v494_v30 = vpop.f32.mrb[3].mxu0 }
  0xf2   : > { %v600_v32 = vmul.f32 %v568_v24, %v491_v25  ;;  %v495_v33 = vadd.f32 %v494_v30, %v2525_v19  ;;  %v581_v24 = vld [vmem:[%s3384_s3 + $0x70] sm:$0xff] }
  0xf3   : > { %v601_v34 = vmul.f32 %v569_v27, %v493_v29 }
  0xf4   : > { %v631_v35 = vadd.f32 %v600_v32, %v599_v28  ;;  %v602_v36 = vmul.f32 %v570_v31, %v495_v33  ;;  %v582_v28 = vld [vmem:[%s3384_s3 + $0x78] sm:$0xff] }
  0xf6   : > { %v632_v37 = vadd.f32 %v602_v36, %v601_v34  ;;  %v498_v38 = vpop.f32.mrb[4].mxu0  ;;  %v583_v36 = vld [vmem:[%s3384_s3 + $0x80] sm:$0xff] }
  0xf7   : > { %v499_v40 = vadd.f32 %v498_v38, %v2523_v18  ;;  %v500_v41 = vpop.f32.mrb[5].mxu0 }
  0xf8   : > { %v2550_v43 = vpack.c.bf16 %v632_v37, %v631_v35  ;;  %v501_v44 = vadd.f32 %v500_v41, %v2525_v19  ;;  %v502_v45 = vpop.f32.mrb[6].mxu0 }
  0xf9   : > { %v603_v47 = vmul.f32 %v571_v39, %v499_v40  ;;  %v503_v48 = vadd.f32 %v502_v45, %v2523_v18  ;;  %v504_v49 = vpop.f32.mrb[7].mxu0  ;;  %v584_v39 = vld [vmem:[%s3384_s3 + $0x88] sm:$0xff] }
  0xfa   : > { %v604_v51 = vmul.f32 %v572_v42, %v501_v44  ;;  %v505_v52 = vadd.f32 %v504_v49, %v2525_v19  ;;  %849 = vrot.lane.b32.xlu0 %v2550_v43, %s2386_s15  ;;  %2079 = vmatprep.mubr.msk.bf16.mxu1 %vm865_vm1, %v2550_v43  ;;  %v585_v44 = vld [vmem:[%s3384_s3 + $0x90] sm:$0xff] }
  0xfb   : > { %v605_v53 = vmul.f32 %v573_v46, %v503_v48  ;;  %v586_v48 = vld [vmem:[%s3384_s3 + $0x98] sm:$0xff] }
  0xfc   : > { %v633_v54 = vadd.f32 %v604_v51, %v603_v47  ;;  %v606_v55 = vmul.f32 %v574_v50, %v505_v52 }
  0xfe   : > { %v634_v56 = vadd.f32 %v606_v55, %v605_v53  ;;  %v508_v57 = vpop.f32.mrb[8].mxu0  ;;  %1075 = vrot.lane.b32.xlu0 %v2550_v43, %s2387_s19 }
  0xff   : > { %v509_v59 = vadd.f32 %v508_v57, %v2523_v18  ;;  %v510_v60 = vpop.f32.mrb[9].mxu0 }
 0x100   : > { %v2574_v62 = vpack.c.bf16 %v634_v56, %v633_v54  ;;  %v511_v63 = vadd.f32 %v510_v60, %v2525_v19  ;;  %v512_v0 = vpop.f32.mrb[10].mxu0  ;;  %v587_v56 = vld [vmem:[%s3384_s3 + $0xa0] sm:$0xff] }
 0x101   : > { %v607_v2 = vmul.f32 %v575_v58, %v509_v59  ;;  %v513_v3 = vadd.f32 %v512_v0, %v2523_v18  ;;  %v514_v4 = vpop.f32.mrb[11].mxu0  ;;  %v588_v59 = vld [vmem:[%s3384_s3 + $0xa8] sm:$0xff]  ;;  %v589_v0 = vld [vmem:[%s3384_s3 + $0xb0] sm:$0xff] }
 0x102   : > { %v608_v6 = vmul.f32 %v576_v61, %v511_v63  ;;  %v515_v7 = vadd.f32 %v514_v4, %v2525_v19  ;;  %851 = vrot.lane.b32.xlu1 %v2574_v62, %s2386_s15  ;;  %v590_v4 = vld [vmem:[%s3384_s3 + $0xb8] sm:$0xff] }
 0x103   : > { %v609_v8 = vmul.f32 %v577_v1, %v513_v3 }
 0x104   : > { %v635_v9 = vadd.f32 %v608_v6, %v607_v2  ;;  %v610_v10 = vmul.f32 %v578_v5, %v515_v7 }
 0x106   : > { %v636_v11 = vadd.f32 %v610_v10, %v609_v8  ;;  %v518_v12 = vpop.f32.mrb[12].mxu0  ;;  %1077 = vrot.lane.b32.xlu1 %v2574_v62, %s2387_s19 }
 0x107   : > { %v519_v16 = vadd.f32 %v518_v12, %v2523_v18  ;;  %v520_v17 = vpop.f32.mrb[13].mxu0  ;;  %v591_v12 = vld [vmem:[%s3384_s3 + $0xc0] sm:$0xff] }
 0x108   : > { %v2596_v21 = vpack.c.bf16 %v636_v11, %v635_v9  ;;  %v521_v22 = vadd.f32 %v520_v17, %v2525_v19  ;;  %v522_v23 = vpop.f32.mrb[14].mxu0  ;;  %v592_v17 = vld [vmem:[%s3384_s3 + $0xc8] sm:$0xff] }
 0x109   : > { %v611_v25 = vmul.f32 %v579_v15, %v519_v16  ;;  %v523_v26 = vadd.f32 %v522_v23, %v2523_v18  ;;  %v524_v27 = vpop.f32.mrb[15].mxu0 }
 0x10a   : > { %v612_v29 = vmul.f32 %v580_v20, %v521_v22  ;;  %v525_v30 = vadd.f32 %v524_v27, %v2525_v19  ;;  %853 = vrot.lane.b32.xlu0 %v2596_v21, %s2386_s15  ;;  %1079 = vrot.lane.b32.xlu1 %v2596_v21, %s2387_s19 }
 0x10b   : > { %v613_v31 = vmul.f32 %v581_v24, %v523_v26  ;;  %v593_v24 = vld [vmem:[%s3384_s3 + $0xd0] sm:$0xff] }
 0x10c   : > { %v637_v32 = vadd.f32 %v612_v29, %v611_v25  ;;  %v614_v33 = vmul.f32 %v582_v28, %v525_v30  ;;  %v594_v28 = vld [vmem:[%s3384_s3 + $0xd8] sm:$0xff] }
 0x10e   : > { %v638_v34 = vadd.f32 %v614_v33, %v613_v31  ;;  %v528_v35 = vpop.f32.mrb[16].mxu0 }
 0x10f   : > { %v529_v37 = vadd.f32 %v528_v35, %v2523_v18  ;;  %v530_v38 = vpop.f32.mrb[17].mxu0 }
 0x110   : > { %v2618_v40 = vpack.c.bf16 %v638_v34, %v637_v32  ;;  %v531_v41 = vadd.f32 %v530_v38, %v2525_v19  ;;  %v532_v42 = vpop.f32.mrb[18].mxu0 }
 0x111   : > { %v615_v45 = vmul.f32 %v583_v36, %v529_v37  ;;  %v533_v46 = vadd.f32 %v532_v42, %v2523_v18  ;;  %v534_v47 = vpop.f32.mrb[19].mxu0  ;;  %v595_v36 = vld [vmem:[%s3384_s3 + $0xe0] sm:$0xff] }
 0x112   : > { %v616_v49 = vmul.f32 %v584_v39, %v531_v41  ;;  %v535_v50 = vadd.f32 %v534_v47, %v2525_v19  ;;  %855 = vrot.lane.b32.xlu0 %v2618_v40, %s2386_s15  ;;  %1081 = vrot.lane.b32.xlu1 %v2618_v40, %s2387_s19  ;;  %v596_v39 = vld [vmem:[%s3384_s3 + $0xe8] sm:$0xff] }
 0x113   : > { %v617_v51 = vmul.f32 %v585_v44, %v533_v46 }
 0x114   : > { %v639_v52 = vadd.f32 %v616_v49, %v615_v45  ;;  %v618_v53 = vmul.f32 %v586_v48, %v535_v50  ;;  %v597_v45 = vld [vmem:[%s3384_s3 + $0xf0] sm:$0xff]  ;;  %v598_v49 = vld [vmem:[%s3384_s3 + $0xf8] sm:$0xff] }
 0x116   : > { %v640_v54 = vadd.f32 %v618_v53, %v617_v51  ;;  %v538_v55 = vpop.f32.mrb[20].mxu0 }
 0x117   : > { %v539_v57 = vadd.f32 %v538_v55, %v2523_v18  ;;  %v540_v58 = vpop.f32.mrb[21].mxu0 }
 0x118   : > { %v2640_v60 = vpack.c.bf16 %v640_v54, %v639_v52  ;;  %v541_v61 = vadd.f32 %v540_v58, %v2525_v19  ;;  %v542_v63 = vpop.f32.mrb[22].mxu0 }
 0x119   : > { %v619_v1 = vmul.f32 %v587_v56, %v539_v57  ;;  %v543_v2 = vadd.f32 %v542_v63, %v2523_v18  ;;  %v544_v3 = vpop.f32.mrb[23].mxu0 }
 0x11a   : > { %v620_v5 = vmul.f32 %v588_v59, %v541_v61  ;;  %v545_v6 = vadd.f32 %v544_v3, %v2525_v19  ;;  %857 = vrot.lane.b32.xlu0 %v2640_v60, %s2386_s15  ;;  %1083 = vrot.lane.b32.xlu1 %v2640_v60, %s2387_s19 }
 0x11b   : > { %v621_v7 = vmul.f32 %v589_v0, %v543_v2 }
 0x11c   : > { %v641_v8 = vadd.f32 %v620_v5, %v619_v1  ;;  %v622_v9 = vmul.f32 %v590_v4, %v545_v6  ;;  %v656_v4 = vld [vmem:[%s2772_s14 + $0x8] sm:$0xff]  ;;  %v655_v5 = vld [vmem:[%s2772_s14] sm:$0xff] }
 0x11e   : > { %v642_v10 = vadd.f32 %v622_v9, %v621_v7  ;;  %v548_v11 = vpop.f32.mrb[24].mxu0  ;;  %v657_v9 = vld [vmem:[%s2772_s14 + $0x10] sm:$0xff] }
 0x11f   : > { %v549_v15 = vadd.f32 %v548_v11, %v2523_v18  ;;  %v550_v16 = vpop.f32.mrb[25].mxu0 }
 0x120   : > { %v2662_v20 = vpack.c.bf16 %v642_v10, %v641_v8  ;;  %v551_v22 = vadd.f32 %v550_v16, %v2525_v19  ;;  %v552_v23 = vpop.f32.mrb[26].mxu0  ;;  %v658_v10 = vld [vmem:[%s2772_s14 + $0x18] sm:$0xff] }
 0x121   : > { %v623_v25 = vmul.f32 %v591_v12, %v549_v15  ;;  %v553_v26 = vadd.f32 %v552_v23, %v2523_v18  ;;  %v554_v27 = vpop.f32.mrb[27].mxu0  ;;  %v659_v12 = vld [vmem:[%s2772_s14 + $0x20] sm:$0xff]  ;;  %v660_v15 = vld [vmem:[%s2772_s14 + $0x28] sm:$0xff]  ;;  %v661_v23 = vld [vmem:[%s2772_s14 + $0x30] sm:$0xff] }
 0x122   : > { %v624_v29 = vmul.f32 %v592_v17, %v551_v22  ;;  %v555_v30 = vadd.f32 %v554_v27, %v2525_v19  ;;  %859 = vrot.lane.b32.xlu0 %v2662_v20, %s2386_s15  ;;  %1085 = vrot.lane.b32.xlu1 %v2662_v20, %s2387_s19  ;;  %v664_v27 = vld [vmem:[%s2772_s14 + $0x48] sm:$0xff] }
 0x123   : > { %v625_v31 = vmul.f32 %v593_v24, %v553_v26  ;;  %v662_v24 = vld [vmem:[%s2772_s14 + $0x38] sm:$0xff]  ;;  %v663_v26 = vld [vmem:[%s2772_s14 + $0x40] sm:$0xff] }
 0x124   : > { %v643_v32 = vadd.f32 %v624_v29, %v623_v25  ;;  %v626_v33 = vmul.f32 %v594_v28, %v555_v30 }
 0x126   : > { %v644_v34 = vadd.f32 %v626_v33, %v625_v31  ;;  %v558_v35 = vpop.f32.mrb[28].mxu0  ;;  %v665_v31 = vld [vmem:[%s2772_s14 + $0x50] sm:$0xff] }
 0x127   : > { %v559_v37 = vadd.f32 %v558_v35, %v2523_v18  ;;  %v560_v38 = vpop.f32.mrb[29].mxu0  ;;  %v668_v35 = vld [vmem:[%s2772_s14 + $0x68] sm:$0xff] }
 0x128   : > { %v2684_v41 = vpack.c.bf16 %v644_v34, %v643_v32  ;;  %v561_v42 = vadd.f32 %v560_v38, %v2525_v19  ;;  %v562_v44 = vpop.f32.mrb[30].mxu0  ;;  %v666_v32 = vld [vmem:[%s2772_s14 + $0x58] sm:$0xff]  ;;  %v667_v34 = vld [vmem:[%s2772_s14 + $0x60] sm:$0xff] }
 0x129   : > { %v627_v46 = vmul.f32 %v595_v36, %v559_v37  ;;  %v563_v47 = vadd.f32 %v562_v44, %v2523_v18  ;;  %v564_v48 = vpop.f32.mrb[31].mxu0 }
 0x12a   : > { %v628_v50 = vmul.f32 %v596_v39, %v561_v42  ;;  %v565_v51 = vadd.f32 %v564_v48, %v2525_v19  ;;  %861 = vrot.lane.b32.xlu0 %v2684_v41, %s2386_s15  ;;  %1087 = vrot.lane.b32.xlu1 %v2684_v41, %s2387_s19  ;;  %v669_v39 = vld [vmem:[%s2772_s14 + $0x70] sm:$0xff]  ;;  %v670_v42 = vld [vmem:[%s2772_s14 + $0x78] sm:$0xff]  ;;  %s2309_s14 = sshll.u32 %s2394_s13, 4  ;;  %s2310_s14 = int_to_ptr.vmem [resolvable:$false] %s2309_s14 }
 0x12b   : > { %v629_v52 = vmul.f32 %v597_v45, %v563_v47  ;;  %s2311_s16 = scalar_lea.vmem %s2310_s14, 16384 }
 0x12c   : > { %v645_v53 = vadd.f32 %v628_v50, %v627_v46  ;;  %v630_v54 = vmul.f32 %v598_v49, %v565_v51 }
 0x12e   : > { %v646_v55 = vadd.f32 %v630_v54, %v629_v52 }
 0x130   : > { %v2699_v56 = vpack.c.bf16 %v646_v55, %v645_v53 }
 0x132   : > { %1089 = vrot.lane.b32.xlu1 %v2699_v56, %s2387_s19  ;;  %863 = vrot.lane.b32.xlu0 %v2699_v56, %s2386_s15  ;;  %s2391_s15 = smov 80   ;;  %s2392_s19 = smov 96  }
 0x136   : > { %1301 = vrot.lane.b32.xlu1 %v2550_v43, %s2388_s28  ;;  %1059 = vrot.lane.b32.xlu0 %v2550_v43, %s2389_s30 }
 0x13a   : > { %1061 = vrot.lane.b32.xlu1 %v2574_v62, %s2389_s30  ;;  %1527 = vrot.lane.b32.xlu0 %v2550_v43, %s2390_s8 }
 0x13e   : > { %1529 = vrot.lane.b32.xlu1 %v2574_v62, %s2390_s8  ;;  %1303 = vrot.lane.b32.xlu0 %v2574_v62, %s2388_s28 }
 0x142   : > { %1531 = vrot.lane.b32.xlu1 %v2596_v21, %s2390_s8  ;;  %1305 = vrot.lane.b32.xlu0 %v2596_v21, %s2388_s28 }
 0x146   : > { %1533 = vrot.lane.b32.xlu1 %v2618_v40, %s2390_s8  ;;  %1307 = vrot.lane.b32.xlu0 %v2618_v40, %s2388_s28 }
 0x14a   : > { %1535 = vrot.lane.b32.xlu1 %v2640_v60, %s2390_s8  ;;  %1309 = vrot.lane.b32.xlu0 %v2640_v60, %s2388_s28 }
 0x14e   : > { %1065 = vrot.lane.b32.xlu1 %v2618_v40, %s2389_s30  ;;  %1063 = vrot.lane.b32.xlu0 %v2596_v21, %s2389_s30 }
 0x152   : > { %1537 = vrot.lane.b32.xlu1 %v2662_v20, %s2390_s8  ;;  %1311 = vrot.lane.b32.xlu0 %v2662_v20, %s2388_s28 }
 0x156   : > { %1069 = vrot.lane.b32.xlu1 %v2662_v20, %s2389_s30  ;;  %1067 = vrot.lane.b32.xlu0 %v2640_v60, %s2389_s30 }
 0x15a   : > { %1539 = vrot.lane.b32.xlu1 %v2684_v41, %s2390_s8  ;;  %1313 = vrot.lane.b32.xlu0 %v2684_v41, %s2388_s28 }
 0x15e   : > { %1073 = vrot.lane.b32.xlu1 %v2699_v56, %s2389_s30  ;;  %1071 = vrot.lane.b32.xlu0 %v2684_v41, %s2389_s30  ;;  %s1998_s30 = sshll.u32 %s2375_s24, 13 }
 0x162   : > { %1541 = vrot.lane.b32.xlu1 %v2699_v56, %s2390_s8  ;;  %1315 = vrot.lane.b32.xlu0 %v2699_v56, %s2388_s28  ;;  %s2968_s28 = scalar_lea.vmem [#allocation2], %s2910_s17 }
 0x163   : > { %s1754_s8 = sshll.u32 %s2968_s28, 4  ;;  %s3327_s8 = int_to_ptr.vmem [resolvable:$true] %s1754_s8 }
 0x164   : > { %s2305_s12 = scalar_lea.vmem %s3327_s8, 8192  ;;  %p2312_p1 = scmp.lt.s32.totalorder %s3327_s8, %s2310_s14 }
 0x165   : > { %p2306_p12 = scmp.ne.s32.totalorder %s3327_s8, %s2305_s12  ;;  %p2313_p2 = scmp.lt.s32.totalorder %s2311_s16, %s2305_s12 }
 0x166   : > { %1511 = vrot.lane.b32.xlu1 %v2550_v43, %s2391_s15  ;;  %1285 = vrot.lane.b32.xlu0 %v2550_v43, %s2392_s19 }
 0x167   : > { %p2307_p13 = pnand %p2306_p12, %p2472_p4  ;;  %p2314_p3 = por %p2313_p2, %p2312_p1 }
 0x169   : > { %p2308_p0 = pneg %p2307_p13 }
 0x16a   : > { %1513 = vrot.lane.b32.xlu1 %v2574_v62, %s2391_s15  ;;  %1287 = vrot.lane.b32.xlu0 %v2574_v62, %s2392_s19 }
 0x16b   : > { %p2315_p5 = pnand %p2314_p3, %p2308_p0 }
 0x16c   : > { %v850_v18 = vpop.permute.xlu0 %849 }
 0x16d   : > { %2191 = vmatprep.subr.msk.bf16.mxu1 %vm865_vm1, %v850_v18  ;;  %v891_v19 = vsel %vm865_vm1, %v850_v18, 0 }
 0x16e   : > { %1515 = vrot.lane.b32.xlu1 %v2596_v21, %s2391_s15  ;;  %1289 = vrot.lane.b32.xlu0 %v2596_v21, %s2392_s19 }
 0x16f   : > { %2064 = vmatpush3.bf16.xpose.msra.mxu1 %v891_v19 }
 0x170   : > { %v1076_v57 = vpop.permute.xlu0 %1075 }
 0x171   : > { %v1116_v43 = vsel %vm865_vm1, %v1076_v57, 0  ;;  %2199 = vmatprep.subr.msk.bf16.mxu0 %vm865_vm1, %v1076_v57 }
 0x172   : > { %1517 = vrot.lane.b32.xlu1 %v2618_v40, %s2391_s15  ;;  %1291 = vrot.lane.b32.xlu0 %v2618_v40, %s2392_s19 }
 0x173   : > { %2096 = vmatpush3.bf16.xpose.msra.mxu0 %v1116_v43 }
 0x174   : > { %v852_v58 = vpop.permute.xlu1 %851 }
 0x175   : > { %2192 = vmatprep.subr.msk.bf16.mxu1 %vm865_vm1, %v852_v58  ;;  %v894_v59 = vsel %vm865_vm1, %v852_v58, 0 }
 0x176   : > { %1519 = vrot.lane.b32.xlu1 %v2640_v60, %s2391_s15  ;;  %1293 = vrot.lane.b32.xlu0 %v2640_v60, %s2392_s19 }
 0x177   : > { %2066 = vmatpush3.bf16.xpose.msra.mxu1 %v894_v59 }
 0x178   : > { %v1078_v61 = vpop.permute.xlu1 %1077 }
 0x179   : > { %v1119_v63 = vsel %vm865_vm1, %v1078_v61, 0  ;;  %2200 = vmatprep.subr.msk.bf16.mxu0 %vm865_vm1, %v1078_v61 }
 0x17a   : > { %1521 = vrot.lane.b32.xlu1 %v2662_v20, %s2391_s15  ;;  %1295 = vrot.lane.b32.xlu0 %v2662_v20, %s2392_s19 }
 0x17b   : > { %2098 = vmatpush3.bf16.xpose.msra.mxu0 %v1119_v63 }
 0x17c   : > { %v854_v0 = vpop.permute.xlu0 %853  ;;  %v1080_v1 = vpop.permute.xlu1 %1079 }
 0x17d   : > { %2193 = vmatprep.subr.msk.bf16.mxu1 %vm865_vm1, %v854_v0  ;;  %v897_v2 = vsel %vm865_vm1, %v854_v0, 0  ;;  %2201 = vmatprep.subr.msk.bf16.mxu0 %vm865_vm1, %v1080_v1  ;;  %v1122_v3 = vsel %vm865_vm1, %v1080_v1, 0 }
 0x17e   : > { %1523 = vrot.lane.b32.xlu1 %v2684_v41, %s2391_s15  ;;  %1297 = vrot.lane.b32.xlu0 %v2684_v41, %s2392_s19 }
 0x17f   : > { %2068 = vmatpush3.bf16.xpose.msra.mxu1 %v897_v2 }
 0x182   : > { %1525 = vrot.lane.b32.xlu1 %v2699_v56, %s2391_s15  ;;  %1299 = vrot.lane.b32.xlu0 %v2699_v56, %s2392_s19  ;;  %s3325_s19 = scalar_lea.hbm %s3387_s6, %s1998_s30 }
 0x183   : > { %2100 = vmatpush3.bf16.xpose.msra.mxu0 %v1122_v3 }
 0x184   : > { %v856_v6 = vpop.permute.xlu0 %855  ;;  %v1082_v7 = vpop.permute.xlu1 %1081 }
 0x185   : > { %2194 = vmatprep.subr.msk.bf16.mxu1 %vm865_vm1, %v856_v6  ;;  %v900_v8 = vsel %vm865_vm1, %v856_v6, 0  ;;  %2202 = vmatprep.subr.msk.bf16.mxu0 %vm865_vm1, %v1082_v7  ;;  %v1125_v11 = vsel %vm865_vm1, %v1082_v7, 0 }
 0x186   : > { %679 = vperm.xlu1 %2290, %v656_v4   ;;  %674 = vperm.xlu0 %2289, %v655_v5  }
 0x187   : > { %2070 = vmatpush3.bf16.xpose.msra.mxu1 %v900_v8 }
 0x18a   : > { %684 = vperm.xlu1 %2290, %v657_v9   ;;  %689 = vperm.xlu0 %2289, %v658_v10  }
 0x18b   : > { %2102 = vmatpush3.bf16.xpose.msra.mxu0 %v1125_v11 }
 0x18c   : > { %v858_v16 = vpop.permute.xlu0 %857  ;;  %v1084_v17 = vpop.permute.xlu1 %1083 }
 0x18d   : > { %2195 = vmatprep.subr.msk.bf16.mxu1 %vm865_vm1, %v858_v16  ;;  %v903_v22 = vsel %vm865_vm1, %v858_v16, 0  ;;  %2203 = vmatprep.subr.msk.bf16.mxu0 %vm865_vm1, %v1084_v17  ;;  %v1128_v25 = vsel %vm865_vm1, %v1084_v17, 0 }
 0x18e   : > { %694 = vperm.xlu1 %2290, %v659_v12   ;;  %699 = vperm.xlu0 %2289, %v660_v15  }
 0x18f   : > { %2072 = vmatpush3.bf16.xpose.msra.mxu1 %v903_v22 }
 0x192   : > { %704 = vperm.xlu1 %2290, %v661_v23   ;;  %709 = vperm.xlu0 %2289, %v662_v24  }
 0x193   : > { %2104 = vmatpush3.bf16.xpose.msra.mxu0 %v1128_v25 }
 0x194   : > { %v860_v28 = vpop.permute.xlu0 %859  ;;  %v1086_v29 = vpop.permute.xlu1 %1085 }
 0x195   : > { %2196 = vmatprep.subr.msk.bf16.mxu1 %vm865_vm1, %v860_v28  ;;  %v906_v30 = vsel %vm865_vm1, %v860_v28, 0  ;;  %2204 = vmatprep.subr.msk.bf16.mxu0 %vm865_vm1, %v1086_v29  ;;  %v1131_v33 = vsel %vm865_vm1, %v1086_v29, 0 }
 0x196   : > { %714 = vperm.xlu1 %2290, %v663_v26   ;;  %719 = vperm.xlu0 %2289, %v664_v27  }
 0x197   : > { %2074 = vmatpush3.bf16.xpose.msra.mxu1 %v906_v30 }
 0x19a   : > { %724 = vperm.xlu1 %2290, %v665_v31   ;;  %729 = vperm.xlu0 %2289, %v666_v32  }
 0x19b   : > { %2106 = vmatpush3.bf16.xpose.msra.mxu0 %v1131_v33 }
 0x19c   : > { %v862_v36 = vpop.permute.xlu0 %861  ;;  %v1088_v37 = vpop.permute.xlu1 %1087 }
 0x19d   : > { %2197 = vmatprep.subr.msk.bf16.mxu1 %vm865_vm1, %v862_v36  ;;  %v909_v38 = vsel %vm865_vm1, %v862_v36, 0  ;;  %2205 = vmatprep.subr.msk.bf16.mxu0 %vm865_vm1, %v1088_v37  ;;  %v1134_v44 = vsel %vm865_vm1, %v1088_v37, 0 }
 0x19e   : > { %734 = vperm.xlu1 %2290, %v667_v34   ;;  %739 = vperm.xlu0 %2289, %v668_v35  }
 0x19f   : > { %2076 = vmatpush3.bf16.xpose.msra.mxu1 %v909_v38 }
 0x1a2   : > { %744 = vperm.xlu1 %2290, %v669_v39   ;;  %749 = vperm.xlu0 %2289, %v670_v42  }
 0x1a3   : > { %2108 = vmatpush3.bf16.xpose.msra.mxu0 %v1134_v44 }
 0x1a4   : > { %v1090_v45 = vpop.permute.xlu1 %1089  ;;  %v864_v46 = vpop.permute.xlu0 %863 }
 0x1a5   : > { %2198 = vmatprep.subr.msk.bf16.mxu1 %vm865_vm1, %v864_v46  ;;  %v912_v47 = vsel %vm865_vm1, %v864_v46, 0  ;;  %2206 = vmatprep.subr.msk.bf16.mxu0 %vm865_vm1, %v1090_v45  ;;  %v1137_v50 = vsel %vm865_vm1, %v1090_v45, 0 }
 0x1a7   : > { %2078 = vmatpush3.bf16.xpose.msra.mxu1 %v912_v47 }
 0x1a8   : > { %v1302_v48 = vpop.permute.xlu1 %1301  ;;  %v1060_v49 = vpop.permute.xlu0 %1059 }
 0x1a9   : > { %2111 = vmatprep.mubr.msk.bf16.mxu0 %vm865_vm1, %v1060_v49  ;;  %2207 = vmatprep.subr.msk.bf16.mxu1 %vm865_vm1, %v1302_v48  ;;  %v1342_v53 = vsel %vm865_vm1, %v1302_v48, 0  ;;  %v2889_v49 = vld [vmem:[%s334_s20] ss:$0 sm:$0xff] }
 0x1ab   : > { %2110 = vmatpush3.bf16.xpose.msra.mxu0 %v1137_v50 }
 0x1ac   : > { %v1062_v51 = vpop.permute.xlu1 %1061  ;;  %v1528_v52 = vpop.permute.xlu0 %1527 }
 0x1ad   : > { %2215 = vmatprep.subr.msk.bf16.mxu0 %vm865_vm1, %v1528_v52  ;;  %v1568_v18 = vsel %vm865_vm1, %v1528_v52, 0  ;;  %v2893_v52 = vand.u32 127, %v359_v13  ;;  %v795_v13 = vadd.s32 32, %v2516_v14 }
 0x1ae   : > { %2080 = vmatmul.mubr.msk.bf16.vlgmr.msra.gmra.mrb[0].mxu1 %vm865_vm1, %v2574_v62 }
 0x1af   : > { %2083 = vmatprep.mubr.msk.bf16.mxu1 %vm865_vm1, %v2596_v21  ;;  %2128 = vmatpush3.bf16.xpose.msra.mxu1 %v1342_v53  ;;  %v794_v53 = vadd.s32 24, %v2516_v14  ;;  %vm809_vm3 = vcmp.gt.s32.totalorder %v2516_v14, %v2893_v52  ;;  %vm813_vm10 = vcmp.gt.s32.totalorder %v795_v13, %v2893_v52 }
 0x1b0   : > { %v1530_v54 = vpop.permute.xlu1 %1529  ;;  %v1304_v55 = vpop.permute.xlu0 %1303 }
 0x1b1   : > { %2208 = vmatprep.subr.msk.bf16.mxu1 %vm865_vm1, %v1304_v55  ;;  %v1345_v43 = vsel %vm865_vm1, %v1304_v55, 0  ;;  %v1571_v58 = vsel %vm865_vm1, %v1530_v54, 0  ;;  %vm812_vm4 = vcmp.gt.s32.totalorder %v794_v53, %v2893_v52 }
 0x1b2   : > { %2112 = vmatmul.mubr.msk.bf16.vlgmr.msra.gmra.mrb[32].mxu0 %vm865_vm1, %v1062_v51  ;;  %v793_v51 = vadd.s32 16, %v2516_v14 }
 0x1b3   : > { %2160 = vmatpush3.bf16.xpose.msra.mxu0 %v1568_v18 }
 0x1b4   : > { %2216 = vmatprep.subr.msk.bf16.mxu0 %vm865_vm1, %v1530_v54  ;;  %v1532_v19 = vpop.permute.xlu1 %1531  ;;  %v1306_v57 = vpop.permute.xlu0 %1305  ;;  %v792_v54 = vadd.s32 8, %v2516_v14  ;;  %vm811_vm2 = vcmp.gt.s32.totalorder %v793_v51, %v2893_v52 }
 0x1b5   : > { %v1348_v63 = vsel %vm865_vm1, %v1306_v57, 0  ;;  %v1574_v0 = vsel %vm865_vm1, %v1532_v19, 0 }
 0x1b6   : > { %2084 = vmatmul.mubr.msk.bf16.gmra.mrb[4].mxu1 %vm865_vm1, %v2618_v40  ;;  %vm810_vm5 = vcmp.gt.s32.totalorder %v792_v54, %v2893_v52 }
 0x1b7   : > { %2087 = vmatprep.mubr.msk.bf16.mxu1 %vm865_vm1, %v2640_v60  ;;  %2130 = vmatpush3.bf16.xpose.msra.mxu1 %v1345_v43 }
 0x1b8   : > { %2209 = vmatprep.subr.msk.bf16.mxu1 %vm865_vm1, %v1306_v57  ;;  %v1534_v62 = vpop.permute.xlu1 %1533  ;;  %v1308_v21 = vpop.permute.xlu0 %1307 }
 0x1b9   : > { %v1577_v4 = vsel %vm865_vm1, %v1534_v62, 0 }
 0x1bb   : > { %2162 = vmatpush3.bf16.xpose.msra.mxu0 %v1571_v58  ;;  %v798_v58 = vadd.s32 56, %v2516_v14 }
 0x1bc   : > { %2217 = vmatprep.subr.msk.bf16.mxu0 %vm865_vm1, %v1532_v19  ;;  %v1536_v59 = vpop.permute.xlu1 %1535  ;;  %v1310_v61 = vpop.permute.xlu0 %1309  ;;  %v797_v19 = vadd.s32 48, %v2516_v14 }
 0x1bd   : > { %v1354_v7 = vsel %vm865_vm1, %v1310_v61, 0  ;;  %v1580_v9 = vsel %vm865_vm1, %v1536_v59, 0  ;;  %vm816_vm12 = vcmp.gt.s32.totalorder %v798_v58, %v2893_v52 }
 0x1be   : > { %2088 = vmatmul.mubr.msk.bf16.gmra.mrb[8].mxu1 %vm865_vm1, %v2662_v20  ;;  %v1351_v20 = vsel %vm865_vm1, %v1308_v21, 0  ;;  %vm815_vm7 = vcmp.gt.s32.totalorder %v797_v19, %v2893_v52 }
 0x1bf   : > { %2091 = vmatprep.mubr.msk.bf16.mxu1 %vm865_vm1, %v2684_v41  ;;  %2132 = vmatpush3.bf16.xpose.msra.mxu1 %v1348_v63 }
 0x1c0   : > { %2210 = vmatprep.subr.msk.bf16.mxu1 %vm865_vm1, %v1308_v21  ;;  %v1066_v40 = vpop.permute.xlu1 %1065  ;;  %v1064_v60 = vpop.permute.xlu0 %1063 }
 0x1c1   : > { %2115 = vmatprep.mubr.msk.bf16.mxu0 %vm865_vm1, %v1064_v60 }
 0x1c2   : > { %2116 = vmatmul.mubr.msk.bf16.gmra.mrb[36].mxu0 %vm865_vm1, %v1066_v40 }
 0x1c3   : > { %2164 = vmatpush3.bf16.xpose.msra.mxu0 %v1574_v0 }
 0x1c4   : > { %2218 = vmatprep.subr.msk.bf16.mxu0 %vm865_vm1, %v1534_v62  ;;  %v1538_v1 = vpop.permute.xlu1 %1537  ;;  %v1312_v2 = vpop.permute.xlu0 %1311 }
 0x1c5   : > { %v1357_v12 = vsel %vm865_vm1, %v1312_v2, 0  ;;  %v1583_v17 = vsel %vm865_vm1, %v1538_v1, 0 }
 0x1c6   : > { %2092 = vmatmul.mubr.msk.bf16.gmra.mrb[12].mxu1 %vm865_vm1, %v2699_v56 }
 0x1c7   : > { %2134 = vmatpush3.bf16.xpose.msra.mxu1 %v1351_v20 }
 0x1c8   : > { %2211 = vmatprep.subr.msk.bf16.mxu1 %vm865_vm1, %v1310_v61  ;;  %v1070_v41 = vpop.permute.xlu1 %1069  ;;  %v1068_v3 = vpop.permute.xlu0 %1067  ;;  %v2393_v61 = vmov 0.0  }
 0x1c9   : > { %2119 = vmatprep.mubr.msk.bf16.mxu0 %vm865_vm1, %v1068_v3  ;;  %v2929_v63 = vsel %vm811_vm2, 2.5e+11, %v2393_v61  ;;  %v2932_v40 = vsel %vm809_vm3, 2.5e+11, %v2393_v61  ;;  %v2948_v3 = vsel %vm815_vm7, 2.5e+11, %v2393_v61 }
 0x1ca   : > { %2120 = vmatmul.mubr.msk.bf16.gmra.mrb[40].mxu0 %vm865_vm1, %v1070_v41 }
 0x1cb   : > { %2166 = vmatpush3.bf16.xpose.msra.mxu0 %v1577_v4 }
 0x1cc   : > { %2219 = vmatprep.subr.msk.bf16.mxu0 %vm865_vm1, %v1536_v59  ;;  %v1540_v5 = vpop.permute.xlu1 %1539  ;;  %v1314_v6 = vpop.permute.xlu0 %1313  ;;  %v796_v59 = vadd.s32 40, %v2516_v14 }
 0x1cd   : > { %v1360_v22 = vsel %vm865_vm1, %v1314_v6, 0  ;;  %v1586_v24 = vsel %vm865_vm1, %v1540_v5, 0 }
 0x1ce   : > { %vm814_vm13 = vcmp.gt.s32.totalorder %v796_v59, %v2893_v52 }
 0x1cf   : > { %2136 = vmatpush3.bf16.xpose.msra.mxu1 %v1354_v7 }
 0x1d0   : > { %2212 = vmatprep.subr.msk.bf16.mxu1 %vm865_vm1, %v1312_v2  ;;  %v1074_v56 = vpop.permute.xlu1 %1073  ;;  %v1072_v8 = vpop.permute.xlu0 %1071  ;;  %v2941_v2 = vsel %vm810_vm5, 2.5e+11, %v2393_v61 }
 0x1d1   : > { %2123 = vmatprep.mubr.msk.bf16.mxu0 %vm865_vm1, %v1072_v8 }
 0x1d2   : > { %2124 = vmatmul.mubr.msk.bf16.gmra.mrb[44].mxu0 %vm865_vm1, %v1074_v56 }
 0x1d3   : > { %2168 = vmatpush3.bf16.xpose.msra.mxu0 %v1580_v9 }
 0x1d4   : > { %2220 = vmatprep.subr.msk.bf16.mxu0 %vm865_vm1, %v1538_v1  ;;  %v1542_v10 = vpop.permute.xlu1 %1541  ;;  %v1316_v11 = vpop.permute.xlu0 %1315  ;;  %v2938_v1 = vsel %vm812_vm4, 2.5e+11, %v2393_v61 }
 0x1d5   : > { %v1363_v26 = vsel %vm865_vm1, %v1316_v11, 0  ;;  %v1589_v28 = vsel %vm865_vm1, %v1542_v10, 0 }
 0x1d7   : > { %2138 = vmatpush3.bf16.xpose.msra.mxu1 %v1357_v12 }
 0x1d8   : > { %2213 = vmatprep.subr.msk.bf16.mxu1 %vm865_vm1, %v1314_v6  ;;  %v1512_v15 = vpop.permute.xlu1 %1511  ;;  %v1286_v16 = vpop.permute.xlu0 %1285 }
 0x1d9   : > { %2143 = vmatprep.mubr.msk.bf16.mxu1 %vm865_vm1, %v1286_v16  ;;  %2175 = vmatprep.mubr.msk.bf16.mxu0 %vm865_vm1, %v1512_v15 }
 0x1db   : > { %2170 = vmatpush3.bf16.xpose.msra.mxu0 %v1583_v17 }
 0x1dc   : > { %2221 = vmatprep.subr.msk.bf16.mxu0 %vm865_vm1, %v1540_v5  ;;  %v1288_v23 = vpop.permute.xlu0 %1287  ;;  %v1514_v25 = vpop.permute.xlu1 %1513 }
 0x1df   : > { %2140 = vmatpush3.bf16.xpose.msra.mxu1 %v1360_v22 }
 0x1e0   : > { %2214 = vmatprep.subr.msk.bf16.mxu1 %vm865_vm1, %v1316_v11  ;;  %v1290_v27 = vpop.permute.xlu0 %1289  ;;  %v1516_v29 = vpop.permute.xlu1 %1515  ;;  %v2965_v11 = vsel %vm813_vm10, 2.5e+11, %v2393_v61 }
 0x1e3   : > { %2172 = vmatpush3.bf16.xpose.msra.mxu0 %v1586_v24 }
 0x1e4   : > { %2222 = vmatprep.subr.msk.bf16.mxu0 %vm865_vm1, %v1542_v10  ;;  %v1292_v30 = vpop.permute.xlu0 %1291  ;;  %v1518_v31 = vpop.permute.xlu1 %1517 }
 0x1e7   : > { %2142 = vmatpush3.bf16.xpose.msra.mxu1 %v1363_v26 }
 0x1e8   : > { %v1294_v32 = vpop.permute.xlu0 %1293  ;;  %v1520_v33 = vpop.permute.xlu1 %1519 }
 0x1eb   : > { %2174 = vmatpush3.bf16.xpose.msra.mxu0 %v1589_v28  ;;  %v2992_v28 = vsel %vm814_vm13, 2.5e+11, %v2393_v61 }
 0x1ec   : > { %v1296_v34 = vpop.permute.xlu0 %1295  ;;  %v1522_v35 = vpop.permute.xlu1 %1521 }
 0x1ee   : > { %2144 = vmatmul.mubr.msk.bf16.vlgmr.msra.gmra.mrb[16].mxu1 %vm865_vm1, %v1288_v23  ;;  %v2980_v23 = vsel %vm816_vm12, 2.5e+11, %v2393_v61 }
 0x1ef   : > { %2147 = vmatprep.mubr.msk.bf16.mxu1 %vm865_vm1, %v1290_v27 }
 0x1f0   : > { %v1298_v36 = vpop.permute.xlu0 %1297  ;;  %v1524_v37 = vpop.permute.xlu1 %1523 }
 0x1f2   : > { %2176 = vmatmul.mubr.msk.bf16.vlgmr.msra.gmra.mrb[48].mxu0 %vm865_vm1, %v1514_v25 }
 0x1f3   : > { %2179 = vmatprep.mubr.msk.bf16.mxu0 %vm865_vm1, %v1516_v29 }
 0x1f4   : > { %v1300_v38 = vpop.permute.xlu0 %1299  ;;  %v1526_v39 = vpop.permute.xlu1 %1525 }
 0x1f6   : > { %2148 = vmatmul.mubr.msk.bf16.gmra.mrb[20].mxu1 %vm865_vm1, %v1292_v30 }
 0x1f7   : > { %2151 = vmatprep.mubr.msk.bf16.mxu1 %vm865_vm1, %v1294_v32 }
 0x1fa   : > { %2180 = vmatmul.mubr.msk.bf16.gmra.mrb[52].mxu0 %vm865_vm1, %v1518_v31 }
 0x1fb   : > { %2183 = vmatprep.mubr.msk.bf16.mxu0 %vm865_vm1, %v1520_v33  ;;  %v801_v33 = vadd.s32 80, %v2516_v14 }
 0x1fd   : > { %vm819_vm2 = vcmp.gt.s32.totalorder %v801_v33, %v2893_v52 }
 0x1fe   : > { %2152 = vmatmul.mubr.msk.bf16.gmra.mrb[24].mxu1 %vm865_vm1, %v1296_v34 }
 0x1ff   : > { %2155 = vmatprep.mubr.msk.bf16.mxu1 %vm865_vm1, %v1298_v36 }
 0x202   : > { %2184 = vmatmul.mubr.msk.bf16.gmra.mrb[56].mxu0 %vm865_vm1, %v1522_v35 }
 0x203   : > { %2187 = vmatprep.mubr.msk.bf16.mxu0 %vm865_vm1, %v1524_v37  ;;  %v799_v37 = vadd.s32 64, %v2516_v14 }
 0x205   : > { %v680_v42 = vpop.permute.xlu1 %679  ;;  %v675_v44 = vpop.permute.xlu0 %674  ;;  %vm817_vm3 = vcmp.gt.s32.totalorder %v799_v37, %v2893_v52  ;;  %v804_v37 = vadd.s32 104, %v2516_v14 }
 0x206   : > { %2156 = vmatmul.mubr.msk.bf16.gmra.mrb[28].mxu1 %vm865_vm1, %v1300_v38  ;;  %v2903_v57 = vmul.f32 %v2889_v49, %v675_v44  ;;  %v2917_v62 = vmul.f32 %v2889_v49, %v680_v42  ;;  %v802_v44 = vadd.s32 88, %v2516_v14 }
 0x208   : > { %vm774_vm8 = vcmp.gt.f32.partialorder %v2903_v57, 0.0  ;;  %vm775_vm11 = vcmp.gt.f32.partialorder %v2917_v62, 0.0  ;;  %vm820_vm4 = vcmp.gt.s32.totalorder %v802_v44, %v2893_v52 }
 0x209   : > { %v685_v45 = vpop.permute.xlu1 %684  ;;  %v690_v46 = vpop.permute.xlu0 %689 }
 0x20a   : > { %2188 = vmatmul.mubr.msk.bf16.gmra.mrb[60].mxu0 %vm865_vm1, %v1526_v39  ;;  %v2899_v18 = vmul.f32 %v2889_v49, %v685_v45  ;;  %v2906_v43 = vmul.f32 %v2889_v49, %v690_v46 }
 0x20c   : > { %vm776_vm6 = vcmp.gt.f32.partialorder %v2899_v18, 0.0  ;;  %vm777_vm9 = vcmp.gt.f32.partialorder %v2906_v43, 0.0 }
 0x20d   : > { %v695_v47 = vpop.permute.xlu1 %694  ;;  %v700_v48 = vpop.permute.xlu0 %699 }
 0x20e   : > { %v2959_v56 = vmul.f32 %v2889_v49, %v695_v47  ;;  %v2984_v24 = vmul.f32 %v2889_v49, %v700_v48 }
 0x210   : > { %vm3389_vm15 = vcmp.gt.f32.partialorder %v2959_v56, 0.0  ;;  %vm779_vm1 = vcmp.gt.f32.partialorder %v2984_v24, 0.0 }
 0x211   : > { %v705_v50 = vpop.permute.xlu1 %704  ;;  %v710_v55 = vpop.permute.xlu0 %709 }
 0x212   : > { %v2955_v7 = vmul.f32 %v2889_v49, %v705_v50  ;;  %v2975_v22 = vmul.f32 %v2889_v49, %v710_v55  ;;  %v800_v50 = vadd.s32 72, %v2516_v14 }
 0x214   : > { %vm3388_vm14 = vcmp.gt.f32.partialorder %v2955_v7, 0.0  ;;  %vm3390_vm0 = vcmp.gt.f32.partialorder %v2975_v22, 0.0  ;;  %vm818_vm5 = vcmp.gt.s32.totalorder %v800_v50, %v2893_v52 }
 0x215   : > { %v2921_v21 = vpop.permute.xlu1 %714  ;;  %v2934_v60 = vpop.permute.xlu0 %719 }
 0x216   : > { %v3029_v19 = vmul.f32 %v2889_v49, %v2921_v21 }
 0x218   : > { %vm782_vm10 = vcmp.gt.f32.partialorder %v3029_v19, 0.0 }
 0x219   : > { %v725_v12 = vpop.permute.xlu1 %724  ;;  %v730_v29 = vpop.permute.xlu0 %729 }
 0x21a   : > { %v3023_v55 = vmul.f32 %v2889_v49, %v725_v12  ;;  %v3040_v21 = vmul.f32 %v2889_v49, %v730_v29  ;;  %v3067_v12 = vsel %vm820_vm4, 2.5e+11, %v2393_v61 }
 0x21c   : > { %vm784_vm7 = vcmp.gt.f32.partialorder %v3023_v55, 0.0  ;;  %vm785_vm12 = vcmp.gt.f32.partialorder %v3040_v21, 0.0 }
 0x21d   : > { %v735_v48 = vpop.permute.xlu1 %734 }
 0x21e   : > { %v3085_v33 = vmul.f32 %v2889_v49, %v735_v48 }
 0x281   : > { %v2081_v0 = vpop.f32.mrb[0].mxu1 }
 0x282   : > { %v1013_v20 = vsel %vm776_vm6, %v2081_v0, -2.5e+11  ;;  %v948_v41 = vpop.f32.mrb[1].mxu1  ;;  %v740_v0 = vpop.permute.xlu0 %739 }
 0x283   : > { %v1029_v4 = vsub.f32 %v1013_v20, %v2929_v63  ;;  %v1011_v5 = vsel %vm774_vm8, %v948_v41, -2.5e+11  ;;  %v2082_v6 = vpop.f32.mrb[2].mxu1 }
 0x284   : > { %v1027_v8 = vsub.f32 %v1011_v5, %v2932_v40  ;;  %v1014_v9 = vsel %vm777_vm9, %v2082_v6, -2.5e+11  ;;  %v951_v10 = vpop.f32.mrb[3].mxu1  ;;  %v805_v6 = vadd.s32 112, %v2516_v14 }
 0x285   : > { %1045 = vst [vmem:[%s2968_s28 + $0x10] sm:$0xff] %v1029_v4  ;;  %v1030_v15 = vsub.f32 %v1014_v9, %v2938_v1  ;;  %v1012_v16 = vsel %vm775_vm11, %v951_v10, -2.5e+11  ;;  %v2113_v17 = vpop.f32.mrb[32].mxu0  ;;  %v3046_v4 = vmul.f32 %v2889_v49, %v2934_v60  ;;  %v3063_v60 = vsel %vm817_vm3, 2.5e+11, %v2393_v61  ;;  %v745_v9 = vpop.permute.xlu1 %744 }
 0x286   : > { %1043 = vst [vmem:[%s2968_s28] sm:$0xff] %v1027_v8  ;;  %v1028_v25 = vsub.f32 %v1012_v16, %v2941_v2  ;;  %v1238_v26 = vsel %vm776_vm6, %v2113_v17, -2.5e+11  ;;  %v1173_v27 = vpop.f32.mrb[33].mxu0  ;;  %v3058_v8 = vsel %vm819_vm2, 2.5e+11, %v2393_v61  ;;  %vm823_vm2 = vcmp.gt.s32.totalorder %v805_v6, %v2893_v52 }
 0x287   : > { %1046 = vst [vmem:[%s2968_s28 + $0x18] sm:$0xff] %v1030_v15  ;;  %v1254_v30 = vsub.f32 %v1238_v26, %v2929_v63  ;;  %v1236_v31 = vsel %vm774_vm8, %v1173_v27, -2.5e+11  ;;  %v2114_v32 = vpop.f32.mrb[34].mxu0  ;;  %v3070_v15 = vsel %vm818_vm5, 2.5e+11, %v2393_v61 }
 0x288   : > { %1044 = vst [vmem:[%s2968_s28 + $0x8] sm:$0xff] %v1028_v25  ;;  %v1252_v34 = vsub.f32 %v1236_v31, %v2932_v40  ;;  %v1239_v35 = vsel %vm777_vm9, %v2114_v32, -2.5e+11  ;;  %v1176_v36 = vpop.f32.mrb[35].mxu0  ;;  %vm783_vm13 = vcmp.gt.f32.partialorder %v3046_v4, 0.0  ;;  %v750_v25 = vpop.permute.xlu0 %749  ;;  %v803_v26 = vadd.s32 96, %v2516_v14 }
 0x289   : > { %1929 = vst [vmem:[%s2968_s28 + $0x90] sm:$0xff] %v1254_v30  ;;  %v1255_v38 = vsub.f32 %v1239_v35, %v2938_v1  ;;  %v1237_v39 = vsel %vm775_vm11, %v1176_v36, -2.5e+11  ;;  %v2085_v42 = vpop.f32.mrb[4].mxu1  ;;  %v3081_v31 = vmul.f32 %v2889_v49, %v745_v9  ;;  %v806_v32 = vadd.s32 120, %v2516_v14 }
 0x28a   : > { %1927 = vst [vmem:[%s2968_s28 + $0x80] sm:$0xff] %v1252_v34  ;;  %v1253_v45 = vsub.f32 %v1237_v39, %v2941_v2  ;;  %v1017_v46 = vsel %vm3388_vm14, %v2085_v42, -2.5e+11  ;;  %v964_v47 = vpop.f32.mrb[5].mxu1  ;;  %v3096_v44 = vmul.f32 %v2889_v49, %v750_v25  ;;  %vm821_vm3 = vcmp.gt.s32.totalorder %v803_v26, %v2893_v52 }
 0x28b   : > { %1930 = vst [vmem:[%s2968_s28 + $0x98] sm:$0xff] %v1255_v38  ;;  %v1033_v51 = vsub.f32 %v1017_v46, %v2948_v3  ;;  %v1015_v53 = vsel %vm3389_vm15, %v964_v47, -2.5e+11  ;;  %v2086_v54 = vpop.f32.mrb[6].mxu1  ;;  %v3105_v46 = vmul.f32 %v2889_v49, %v740_v0  ;;  %vm788_vm4 = vcmp.gt.f32.partialorder %v3081_v31, 0.0 }
 0x28c   : > { %1928 = vst [vmem:[%s2968_s28 + $0x88] sm:$0xff] %v1253_v45  ;;  %v1031_v13 = vsub.f32 %v1015_v53, %v2965_v11  ;;  %v1018_v58 = vsel %vm3390_vm0, %v2086_v54, -2.5e+11  ;;  %v967_v59 = vpop.f32.mrb[7].mxu1  ;;  %v3101_v45 = vsel %vm823_vm2, 2.5e+11, %v2393_v61  ;;  %vm824_vm5 = vcmp.gt.s32.totalorder %v806_v32, %v2893_v52 }
 0x28d   : > { %1049 = vst [vmem:[%s2968_s28 + $0x30] sm:$0xff] %v1033_v51  ;;  %v1034_v20 = vsub.f32 %v1018_v58, %v2980_v23  ;;  %v1016_v41 = vsel %vm779_vm1, %v967_v59, -2.5e+11  ;;  %vm786_vm2 = vcmp.gt.f32.partialorder %v3085_v33, 0.0  ;;  %v3141_v9 = vsel %vm824_vm5, 2.5e+11, %v2393_v61 }
 0x28e   : > { %1047 = vst [vmem:[%s2968_s28 + $0x20] sm:$0xff] %v1031_v13  ;;  %v1032_v5 = vsub.f32 %v1016_v41, %v2992_v28 }
 0x28f   : > { %1050 = vst [vmem:[%s2968_s28 + $0x38] sm:$0xff] %v1034_v20  ;;  %v3131_v20 = vsel %vm821_vm3, 2.5e+11, %v2393_v61 }
 0x290   : > { %1048 = vst [vmem:[%s2968_s28 + $0x28] sm:$0xff] %v1032_v5 }
 0x291   : > { %v2089_v10 = vpop.f32.mrb[8].mxu1 }
 0x292   : > { %v1021_v16 = vsel %vm784_vm7, %v2089_v10, -2.5e+11  ;;  %v980_v17 = vpop.f32.mrb[9].mxu1 }
 0x293   : > { %v1037_v27 = vsub.f32 %v1021_v16, %v3058_v8  ;;  %v1019_v29 = vsel %vm782_vm10, %v980_v17, -2.5e+11  ;;  %v2090_v30 = vpop.f32.mrb[10].mxu1 }
 0x294   : > { %v1035_v34 = vsub.f32 %v1019_v29, %v3063_v60  ;;  %v1022_v35 = vsel %vm785_vm12, %v2090_v30, -2.5e+11  ;;  %v983_v36 = vpop.f32.mrb[11].mxu1 }
 0x295   : > { %1053 = vst [vmem:[%s2968_s28 + $0x50] sm:$0xff] %v1037_v27  ;;  %v1038_v38 = vsub.f32 %v1022_v35, %v3067_v12  ;;  %v1020_v39 = vsel %vm783_vm13, %v983_v36, -2.5e+11  ;;  %v2117_v42 = vpop.f32.mrb[36].mxu0 }
 0x296   : > { %1051 = vst [vmem:[%s2968_s28 + $0x40] sm:$0xff] %v1035_v34  ;;  %v1036_v14 = vsub.f32 %v1020_v39, %v3070_v15  ;;  %v1242_v47 = vsel %vm3388_vm14, %v2117_v42, -2.5e+11  ;;  %v1189_v48 = vpop.f32.mrb[37].mxu0  ;;  %vm822_vm14 = vcmp.gt.s32.totalorder %v804_v37, %v2893_v52 }
 0x297   : > { %1054 = vst [vmem:[%s2968_s28 + $0x58] sm:$0xff] %v1038_v38  ;;  %v1258_v50 = vsub.f32 %v1242_v47, %v2948_v3  ;;  %v1240_v51 = vsel %vm3389_vm15, %v1189_v48, -2.5e+11  ;;  %v2118_v49 = vpop.f32.mrb[38].mxu0  ;;  %vm789_vm15 = vcmp.gt.f32.partialorder %v3096_v44, 0.0 }
 0x298   : > { %1052 = vst [vmem:[%s2968_s28 + $0x48] sm:$0xff] %v1036_v14  ;;  %v1256_v53 = vsub.f32 %v1240_v51, %v2965_v11  ;;  %v1243_v54 = vsel %vm3390_vm0, %v2118_v49, -2.5e+11  ;;  %v1192_v13 = vpop.f32.mrb[39].mxu0  ;;  %vm787_vm0 = vcmp.gt.f32.partialorder %v3105_v46, 0.0 }
 0x299   : > { %1933 = vst [vmem:[%s2968_s28 + $0xb0] sm:$0xff] %v1258_v50  ;;  %v1259_v58 = vsub.f32 %v1243_v54, %v2980_v23  ;;  %v2093_v59 = vpop.f32.mrb[12].mxu1  ;;  %v1241_v0 = vsel %vm779_vm1, %v1192_v13, -2.5e+11  ;;  %v3150_v25 = vsel %vm822_vm14, 2.5e+11, %v2393_v61 }
 0x29a   : > { %1931 = vst [vmem:[%s2968_s28 + $0xa0] sm:$0xff] %v1256_v53  ;;  %v1025_v41 = vsel %vm788_vm4, %v2093_v59, -2.5e+11  ;;  %v1257_v5 = vsub.f32 %v1241_v0, %v2992_v28  ;;  %v996_v6 = vpop.f32.mrb[13].mxu1 }
 0x29b   : > { %1934 = vst [vmem:[%s2968_s28 + $0xb8] sm:$0xff] %v1259_v58  ;;  %v1041_v10 = vsub.f32 %v1025_v41, %v3101_v45  ;;  %v1023_v16 = vsel %vm786_vm2, %v996_v6, -2.5e+11  ;;  %v2094_v17 = vpop.f32.mrb[14].mxu1 }
 0x29c   : > { %1932 = vst [vmem:[%s2968_s28 + $0xa8] sm:$0xff] %v1257_v5  ;;  %v1039_v26 = vsub.f32 %v1023_v16, %v3131_v20  ;;  %v1026_v27 = vsel %vm789_vm15, %v2094_v17, -2.5e+11  ;;  %v999_v29 = vpop.f32.mrb[15].mxu1 }
 0x29d   : > { %1057 = vst [vmem:[%s2968_s28 + $0x70] sm:$0xff] %v1041_v10  ;;  %v1042_v30 = vsub.f32 %v1026_v27, %v3141_v9  ;;  %v1024_v32 = vsel %vm787_vm0, %v999_v29, -2.5e+11  ;;  %v2121_v34 = vpop.f32.mrb[40].mxu0 }
 0x29e   : > { %1055 = vst [vmem:[%s2968_s28 + $0x60] sm:$0xff] %v1039_v26  ;;  %v1040_v52 = vsub.f32 %v1024_v32, %v3150_v25  ;;  %v1246_v61 = vsel %vm784_vm7, %v2121_v34, -2.5e+11  ;;  %v1205_v35 = vpop.f32.mrb[41].mxu0 }
 0x29f   : > { %1058 = vst [vmem:[%s2968_s28 + $0x78] sm:$0xff] %v1042_v30  ;;  %v1262_v36 = vsub.f32 %v1246_v61, %v3058_v8  ;;  %v1244_v37 = vsel %vm782_vm10, %v1205_v35, -2.5e+11  ;;  %v2122_v38 = vpop.f32.mrb[42].mxu0 }
 0x2a0   : > { %1056 = vst [vmem:[%s2968_s28 + $0x68] sm:$0xff] %v1040_v52  ;;  %v1260_v39 = vsub.f32 %v1244_v37, %v3063_v60  ;;  %v1247_v42 = vsel %vm785_vm12, %v2122_v38, -2.5e+11  ;;  %v1208_v14 = vpop.f32.mrb[43].mxu0 }
 0x2a1   : > { %1937 = vst [vmem:[%s2968_s28 + $0xd0] sm:$0xff] %v1262_v36  ;;  %v1263_v47 = vsub.f32 %v1247_v42, %v3067_v12  ;;  %v1245_v48 = vsel %vm783_vm13, %v1208_v14, -2.5e+11 }
 0x2a2   : > { %1935 = vst [vmem:[%s2968_s28 + $0xc0] sm:$0xff] %v1260_v39  ;;  %v1261_v50 = vsub.f32 %v1245_v48, %v3070_v15 }
 0x2a3   : > { %1938 = vst [vmem:[%s2968_s28 + $0xd8] sm:$0xff] %v1263_v47 }
 0x2a4   : > { %1936 = vst [vmem:[%s2968_s28 + $0xc8] sm:$0xff] %v1261_v50 }
 0x2a5   : > { %v2125_v51 = vpop.f32.mrb[44].mxu0 }
 0x2a6   : > { %v1250_v49 = vsel %vm788_vm4, %v2125_v51, -2.5e+11  ;;  %v1221_v53 = vpop.f32.mrb[45].mxu0 }
 0x2a7   : > { %v1266_v54 = vsub.f32 %v1250_v49, %v3101_v45  ;;  %v1248_v13 = vsel %vm786_vm2, %v1221_v53, -2.5e+11  ;;  %v2126_v58 = vpop.f32.mrb[46].mxu0 }
 0x2a8   : > { %v1264_v59 = vsub.f32 %v1248_v13, %v3131_v20  ;;  %v1251_v0 = vsel %vm789_vm15, %v2126_v58, -2.5e+11  ;;  %v1224_v41 = vpop.f32.mrb[47].mxu0 }
 0x2a9   : > { %1941 = vst [vmem:[%s2968_s28 + $0xf0] sm:$0xff] %v1266_v54  ;;  %v1267_v5 = vsub.f32 %v1251_v0, %v3141_v9  ;;  %v1249_v6 = vsel %vm787_vm0, %v1224_v41, -2.5e+11 }
 0x2aa   : > { %1939 = vst [vmem:[%s2968_s28 + $0xe0] sm:$0xff] %v1264_v59  ;;  %v1265_v10 = vsub.f32 %v1249_v6, %v3150_v25 }
 0x2ab   : > { %1942 = vst [vmem:[%s2968_s28 + $0xf8] sm:$0xff] %v1267_v5 }
 0x2ac   : > { %1940 = vst [vmem:[%s2968_s28 + $0xe8] sm:$0xff] %v1265_v10 }
 0x2c1   : > { %v2145_v16 = vpop.f32.mrb[16].mxu1 }
 0x2c2   : > { %v1464_v17 = vsel %vm776_vm6, %v2145_v16, -2.5e+11  ;;  %v1399_v26 = vpop.f32.mrb[17].mxu1 }
 0x2c3   : > { %v1480_v27 = vsub.f32 %v1464_v17, %v2929_v63  ;;  %v1462_v29 = vsel %vm774_vm8, %v1399_v26, -2.5e+11  ;;  %v2146_v30 = vpop.f32.mrb[18].mxu1 }
 0x2c4   : > { %v1478_v32 = vsub.f32 %v1462_v29, %v2932_v40  ;;  %v1465_v34 = vsel %vm777_vm9, %v2146_v30, -2.5e+11  ;;  %v1402_v52 = vpop.f32.mrb[19].mxu1 }
 0x2c5   : > { %1953 = vst [vmem:[%s2968_s28 + $0x110] sm:$0xff] %v1480_v27  ;;  %v1481_v61 = vsub.f32 %v1465_v34, %v2938_v1  ;;  %v1463_v35 = vsel %vm775_vm11, %v1402_v52, -2.5e+11  ;;  %v2177_v36 = vpop.f32.mrb[48].mxu0 }
 0x2c6   : > { %1951 = vst [vmem:[%s2968_s28 + $0x100] sm:$0xff] %v1478_v32  ;;  %v1479_v37 = vsub.f32 %v1463_v35, %v2941_v2  ;;  %v1690_v38 = vsel %vm776_vm6, %v2177_v36, -2.5e+11  ;;  %v1625_v39 = vpop.f32.mrb[49].mxu0  ;;  %vm3393_vm6 = vcmp.gt.f32.partialorder %v2955_v7, 0.0 }
 0x2c7   : > { %1954 = vst [vmem:[%s2968_s28 + $0x118] sm:$0xff] %v1481_v61  ;;  %v1706_v42 = vsub.f32 %v1690_v38, %v2929_v63  ;;  %v1688_v14 = vsel %vm774_vm8, %v1625_v39, -2.5e+11  ;;  %v2178_v47 = vpop.f32.mrb[50].mxu0  ;;  %vm3394_vm8 = vcmp.gt.f32.partialorder %v2959_v56, 0.0 }
 0x2c8   : > { %1952 = vst [vmem:[%s2968_s28 + $0x108] sm:$0xff] %v1479_v37  ;;  %v1704_v48 = vsub.f32 %v1688_v14, %v2932_v40  ;;  %v1691_v50 = vsel %vm777_vm9, %v2178_v47, -2.5e+11  ;;  %v1628_v51 = vpop.f32.mrb[51].mxu0  ;;  %vm3395_vm9 = vcmp.gt.f32.partialorder %v2975_v22, 0.0  ;;  %vm3397_vm14 = vmmov %vm3394_vm8 }
 0x2c9   : > { %1977 = vst [vmem:[%s2968_s28 + $0x190] sm:$0xff] %v1706_v42  ;;  %v1707_v18 = vsub.f32 %v1691_v50, %v2938_v1  ;;  %v1689_v49 = vsel %vm775_vm11, %v1628_v51, -2.5e+11  ;;  %v2149_v63 = vpop.f32.mrb[20].mxu1  ;;  %vm3396_vm11 = vmmov %vm3393_vm6 }
 0x2ca   : > { %1975 = vst [vmem:[%s2968_s28 + $0x180] sm:$0xff] %v1704_v48  ;;  %v1705_v57 = vsub.f32 %v1689_v49, %v2941_v2  ;;  %v1468_v53 = vsel %vm3393_vm6, %v2149_v63, -2.5e+11  ;;  %v1415_v40 = vpop.f32.mrb[21].mxu1  ;;  %vm3398_vm3 = vmmov %vm3395_vm9 }
 0x2cb   : > { %1978 = vst [vmem:[%s2968_s28 + $0x198] sm:$0xff] %v1707_v18  ;;  %v1484_v43 = vsub.f32 %v1468_v53, %v2948_v3  ;;  %v1466_v54 = vsel %vm3394_vm8, %v1415_v40, -2.5e+11  ;;  %v2150_v1 = vpop.f32.mrb[22].mxu1 }
 0x2cc   : > { %1976 = vst [vmem:[%s2968_s28 + $0x188] sm:$0xff] %v1705_v57  ;;  %v1482_v62 = vsub.f32 %v1466_v54, %v2965_v11  ;;  %v1469_v13 = vsel %vm3395_vm9, %v2150_v1, -2.5e+11  ;;  %v1418_v2 = vpop.f32.mrb[23].mxu1 }
 0x2cd   : > { %1957 = vst [vmem:[%s2968_s28 + $0x130] sm:$0xff] %v1484_v43  ;;  %v1485_v58 = vsub.f32 %v1469_v13, %v2980_v23  ;;  %v1467_v59 = vsel %vm779_vm1, %v1418_v2, -2.5e+11  ;;  %v2181_v0 = vpop.f32.mrb[52].mxu0 }
 0x2ce   : > { %1955 = vst [vmem:[%s2968_s28 + $0x120] sm:$0xff] %v1482_v62  ;;  %v1483_v41 = vsub.f32 %v1467_v59, %v2992_v28  ;;  %v1694_v5 = vsel %vm3396_vm11, %v2181_v0, -2.5e+11  ;;  %v1641_v6 = vpop.f32.mrb[53].mxu0 }
 0x2cf   : > { %1958 = vst [vmem:[%s2968_s28 + $0x138] sm:$0xff] %v1485_v58  ;;  %v1710_v10 = vsub.f32 %v1694_v5, %v2948_v3  ;;  %v1692_v16 = vsel %vm3397_vm14, %v1641_v6, -2.5e+11  ;;  %v2182_v17 = vpop.f32.mrb[54].mxu0 }
 0x2d0   : > { %1956 = vst [vmem:[%s2968_s28 + $0x128] sm:$0xff] %v1483_v41  ;;  %v1708_v26 = vsub.f32 %v1692_v16, %v2965_v11  ;;  %v1695_v27 = vsel %vm3398_vm3, %v2182_v17, -2.5e+11  ;;  %v1644_v29 = vpop.f32.mrb[55].mxu0 }
 0x2d1   : > { %1981 = vst [vmem:[%s2968_s28 + $0x1b0] sm:$0xff] %v1710_v10  ;;  %v1711_v7 = vsub.f32 %v1695_v27, %v2980_v23  ;;  %v1693_v30 = vsel %vm779_vm1, %v1644_v29, -2.5e+11  ;;  %v2153_v3 = vpop.f32.mrb[24].mxu1 }
 0x2d2   : > { %1979 = vst [vmem:[%s2968_s28 + $0x1a0] sm:$0xff] %v1708_v26  ;;  %v1709_v56 = vsub.f32 %v1693_v30, %v2992_v28  ;;  %v1472_v32 = vsel %vm784_vm7, %v2153_v3, -2.5e+11  ;;  %v1431_v11 = vpop.f32.mrb[25].mxu1 }
 0x2d3   : > { %1982 = vst [vmem:[%s2968_s28 + $0x1b8] sm:$0xff] %v1711_v7  ;;  %v1488_v22 = vsub.f32 %v1472_v32, %v3058_v8  ;;  %v1470_v34 = vsel %vm782_vm10, %v1431_v11, -2.5e+11  ;;  %v2154_v23 = vpop.f32.mrb[26].mxu1 }
 0x2d4   : > { %1980 = vst [vmem:[%s2968_s28 + $0x1a8] sm:$0xff] %v1709_v56  ;;  %v1486_v24 = vsub.f32 %v1470_v34, %v3063_v60  ;;  %v1473_v52 = vsel %vm785_vm12, %v2154_v23, -2.5e+11  ;;  %v1434_v28 = vpop.f32.mrb[27].mxu1 }
 0x2d5   : > { %1961 = vst [vmem:[%s2968_s28 + $0x150] sm:$0xff] %v1488_v22  ;;  %v1489_v61 = vsub.f32 %v1473_v52, %v3067_v12  ;;  %v1471_v35 = vsel %vm783_vm13, %v1434_v28, -2.5e+11  ;;  %v2185_v36 = vpop.f32.mrb[56].mxu0 }
 0x2d6   : > { %1959 = vst [vmem:[%s2968_s28 + $0x140] sm:$0xff] %v1486_v24  ;;  %v1487_v37 = vsub.f32 %v1471_v35, %v3070_v15  ;;  %v1698_v38 = vsel %vm784_vm7, %v2185_v36, -2.5e+11  ;;  %v1657_v39 = vpop.f32.mrb[57].mxu0 }
 0x2d7   : > { %1962 = vst [vmem:[%s2968_s28 + $0x158] sm:$0xff] %v1489_v61  ;;  %v1714_v42 = vsub.f32 %v1698_v38, %v3058_v8  ;;  %v1696_v14 = vsel %vm782_vm10, %v1657_v39, -2.5e+11  ;;  %v2186_v47 = vpop.f32.mrb[58].mxu0 }
 0x2d8   : > { %1960 = vst [vmem:[%s2968_s28 + $0x148] sm:$0xff] %v1487_v37  ;;  %v1712_v48 = vsub.f32 %v1696_v14, %v3063_v60  ;;  %v1699_v50 = vsel %vm785_vm12, %v2186_v47, -2.5e+11  ;;  %v1660_v51 = vpop.f32.mrb[59].mxu0 }
 0x2d9   : > { %1985 = vst [vmem:[%s2968_s28 + $0x1d0] sm:$0xff] %v1714_v42  ;;  %v1715_v55 = vsub.f32 %v1699_v50, %v3067_v12  ;;  %v1697_v18 = vsel %vm783_vm13, %v1660_v51, -2.5e+11  ;;  %v2157_v8 = vpop.f32.mrb[28].mxu1 }
 0x2da   : > { %1983 = vst [vmem:[%s2968_s28 + $0x1c0] sm:$0xff] %v1712_v48  ;;  %v1713_v19 = vsub.f32 %v1697_v18, %v3070_v15  ;;  %v1476_v49 = vsel %vm788_vm4, %v2157_v8, -2.5e+11  ;;  %v1447_v60 = vpop.f32.mrb[29].mxu1 }
 0x2db   : > { %1986 = vst [vmem:[%s2968_s28 + $0x1d8] sm:$0xff] %v1715_v55  ;;  %v1492_v21 = vsub.f32 %v1476_v49, %v3101_v45  ;;  %v1474_v12 = vsel %vm786_vm2, %v1447_v60, -2.5e+11  ;;  %v2158_v4 = vpop.f32.mrb[30].mxu1 }
 0x2dc   : > { %1984 = vst [vmem:[%s2968_s28 + $0x1c8] sm:$0xff] %v1713_v19  ;;  %v1490_v63 = vsub.f32 %v1474_v12, %v3131_v20  ;;  %v1477_v15 = vsel %vm789_vm15, %v2158_v4, -2.5e+11  ;;  %v1450_v57 = vpop.f32.mrb[31].mxu1 }
 0x2dd   : > { %1965 = vst [vmem:[%s2968_s28 + $0x170] sm:$0xff] %v1492_v21  ;;  %v1493_v53 = vsub.f32 %v1477_v15, %v3141_v9  ;;  %v1475_v40 = vsel %vm787_vm0, %v1450_v57, -2.5e+11  ;;  %v2189_v43 = vpop.f32.mrb[60].mxu0 }
 0x2de   : > { %1963 = vst [vmem:[%s2968_s28 + $0x160] sm:$0xff] %v1490_v63  ;;  %v1491_v54 = vsub.f32 %v1475_v40, %v3150_v25  ;;  %v1702_v1 = vsel %vm788_vm4, %v2189_v43, -2.5e+11  ;;  %v1673_v62 = vpop.f32.mrb[61].mxu0 }
 0x2df   : > { %1966 = vst [vmem:[%s2968_s28 + $0x178] sm:$0xff] %v1493_v53  ;;  %v1718_v13 = vsub.f32 %v1702_v1, %v3101_v45  ;;  %v1700_v2 = vsel %vm786_vm2, %v1673_v62, -2.5e+11  ;;  %v2190_v58 = vpop.f32.mrb[62].mxu0 }
 0x2e0   : > { %1964 = vst [vmem:[%s2968_s28 + $0x168] sm:$0xff] %v1491_v54  ;;  %v1716_v59 = vsub.f32 %v1700_v2, %v3131_v20  ;;  %v1703_v31 = vsel %vm789_vm15, %v2190_v58, -2.5e+11  ;;  %v1676_v0 = vpop.f32.mrb[63].mxu0 }
 0x2e1   : > { %1989 = vst [vmem:[%s2968_s28 + $0x1f0] sm:$0xff] %v1718_v13  ;;  %v1719_v41 = vsub.f32 %v1703_v31, %v3141_v9  ;;  %v1701_v5 = vsel %vm787_vm0, %v1676_v0, -2.5e+11 }
 0x2e2   : > { %1987 = vst [vmem:[%s2968_s28 + $0x1e0] sm:$0xff] %v1716_v59  ;;  %v1717_v33 = vsub.f32 %v1701_v5, %v3150_v25 }
 0x2e3   : > { %1990 = vst [vmem:[%s2968_s28 + $0x1f8] sm:$0xff] %v1719_v41 }
 0x2e4   : > { %1988 = vst [vmem:[%s2968_s28 + $0x1e8] sm:$0xff] %v1717_v33 }
 0x2e5   : > { %2318 = shalt.err (!%p2315_p5)
}
 0x2e6   : > { %s2319_s18 = scalar_lea.hbm %s3325_s19, 8192  ;;  %s2323_s17 = scalar_lea.hbm %s3387_s6, 16384 }
 0x2e7   : > { %p2320_p6 = scmp.ne.s32.totalorder %s3325_s19, %s2319_s18  ;;  %p2324_p10 = scmp.lt.u32.totalorder %s3325_s19, %s3387_s6 }
 0x2e8   : > { %p2325_p11 = scmp.lt.u32.totalorder %s2323_s17, %s2319_s18  ;;  %p2327_p13 = scmp.lt.u32.totalorder %s2319_s18, %s3325_s19 }
 0x2e9   : > { %p2321_p7 = pnand %p2320_p6, %p2472_p4 }
 0x2ea   : > { %p2326_p12 = por %p2325_p11, %p2324_p10 }
 0x2eb   : > { %p2322_p9 = pneg %p2321_p7 }
 0x2ec   : > { %p2328_p0 = por %p2327_p13, %p2326_p12 }
 0x2ee   : > { %p2329_p1 = pnand %p2328_p0, %p2322_p9 }
 0x2f0   : > { %2332 = shalt.err (!%p2329_p1)
}
 0x2f1   : > { %s2395_s24 = smov 128   ;;  %s2396_s15 = smov 8  }
 0x2f2   : > { %2223 = dma.vmem_to_hbm [thread:$0]  (%p2472_p4), %s3327_s8, 8192, %s3325_s19, %s3335_s11, %s2395_s24, %s2395_s24, %s2396_s15  }
 0x2f3 PF: > { %p2229_p2 = scmp.ge.s32.totalorder %s2383_s26, 2  ;;  %s1769_s12 = sand.u32 1, %s2363_s21  }
 0x2f4   : > { %s1770_s13 = scalar_lea.sflag [#allocation3], %s1769_s12 }
 0x2f5   : > { %p2226_p3 = pnand %p2229_p2, %p2479_p8 }
 0x2f7   : > { %2358 = dma.done.wait (!%p2226_p3), %s1770_s13, 8192  }
 0x2f8   : > { %2360 = vsyncadd (!%p2226_p3), %s1770_s13, 4294959104  ;;  %s19_s26 = sadd.s32 1, %s2383_s26   ;;  %s3399_s21 = smov %s2367_s22 }
 0x2f9   : > { %p16_p5 = scmp.ge.s32.totalorder %s19_s26, 4   ;;  %s3400_s22 = smov %s2371_s23 }
 0x2fa   : > { %s3401_s23 = smov %s2485_s10  ;;  %s3402_s24 = smov %s2379_s25 }
 0x2fb   : > { %s3403_s25 = smov %s3405_s29  ;;  %18 = sbr.rel (!%p16_p5) target bundleno = 4 (0x4), region = 94 }
 0x302   :  { %1775 = vsyncpa [#allocation3], 1 }
 0x303   :  { %1777 = vsyncpa [#allocation3 + $0x1], 1 }

</bundles_post_ra>
